<compile_context>
chip_gen: v5e
topology: v5e:2x2
jax: 0.10.0
libtpu: 0.0.40
codegen_flags: <defaults>
</compile_context>

<pallas_src>
import functools
import math

import jax
import jax.numpy as jnp
from jax.experimental import pallas as pl
from jax.experimental.pallas import tpu as pltpu


# ----------------------------------------------------------------------------
# Config (small synthetic sizes consistent with the module's forward)
# ----------------------------------------------------------------------------
class Config:
    vocab_size = 64
    hidden_size = 32
    num_heads = 2
    intermediate_size = 64
    num_layers = 2
    num_labels = 4
    block_size = 8          # sequence length S
    padding_idx = 1         # RoBERTa pad token id
    max_position = 16       # > S + padding_idx
    layer_norm_eps = 1e-5


# ----------------------------------------------------------------------------
# The fused whole-model Pallas kernel
# ----------------------------------------------------------------------------
def _codebert_kernel(
        ids_ref, pos_ref, bias_ref,
        word_emb_ref, pos_emb_ref, tok_emb_ref,
        emb_ln_g_ref, emb_ln_b_ref,
        qkv_w_ref, qkv_b_ref,
        ao_w_ref, ao_b_ref, a_ln_g_ref, a_ln_b_ref,
        fi_w_ref, fi_b_ref, fo_w_ref, fo_b_ref, f_ln_g_ref, f_ln_b_ref,
        cd_w_ref, cd_b_ref, co_w_ref, co_b_ref,
        logits_ref, prob_ref,
        x_sc,
        *, B, S, H, nH, V, P, num_layers, eps):
    BS = B * S
    Dh = H // nH

    def layer_norm(x, g, b):
        mean = jnp.mean(x, axis=-1, keepdims=True)
        var = jnp.mean((x - mean) ** 2, axis=-1, keepdims=True)
        return (x - mean) * jax.lax.rsqrt(var + eps) * g + b

    def mm(a, w):
        # bf16 operands (MXU-native), f32 accumulation.
        return jnp.dot(a.astype(jnp.bfloat16), w.astype(jnp.bfloat16),
                       preferred_element_type=jnp.float32)

    # ---- embeddings: one-hot matmuls on the MXU (exact f32 row selection) ----
    ids = ids_ref[...]                                              # (BS, 1) int32
    pos = pos_ref[...]                                              # (BS, 1) int32
    onehot_w = (jax.lax.broadcasted_iota(jnp.int32, (BS, V), 1) == ids
                ).astype(jnp.float32)                               # (BS, V)
    onehot_p = (jax.lax.broadcasted_iota(jnp.int32, (BS, P), 1) == pos
                ).astype(jnp.float32)                               # (BS, P)
    x = jnp.dot(onehot_w, word_emb_ref[...], preferred_element_type=jnp.float32)
    x = x + jnp.dot(onehot_p, pos_emb_ref[...], preferred_element_type=jnp.float32)
    x = x + tok_emb_ref[...]                                        # (1, H) broadcast
    x = layer_norm(x, emb_ln_g_ref[...], emb_ln_b_ref[...])         # (BS, H)

    bias = bias_ref[...]                                            # (B, 1, S) additive mask

    # Static unroll over layers: fine at L=2 / these weight sizes.  At real
    # CodeBERT sizes this must become a layer-streamed grid axis (review).
    for li in range(num_layers):
        # ---- self-attention: fused QKV matmul + per-head batched contractions ----
        qkv = mm(x, qkv_w_ref[li]) + qkv_b_ref[li]                  # (BS, 3H)
        attn = jnp.zeros((BS, H), jnp.float32)
        for h in range(nH):
            c0 = h * Dh
            q3 = qkv[:, c0:c0 + Dh].reshape(B, S, Dh)               # (B, S, Dh)
            k3 = qkv[:, H + c0:H + c0 + Dh].reshape(B, S, Dh)
            v3 = qkv[:, 2 * H + c0:2 * H + c0 + Dh].reshape(B, S, Dh)
            # scores; 1/sqrt(Dh) is pre-folded into the Q weights at init
            s = jnp.einsum('bqd,bkd->bqk',
                           q3.astype(jnp.bfloat16), k3.astype(jnp.bfloat16),
                           preferred_element_type=jnp.float32) + bias   # (B, S, S)
            m = jnp.max(s, axis=-1, keepdims=True)
            p = jnp.exp(s - m)
            p = p * pl.reciprocal(jnp.sum(p, axis=-1, keepdims=True), approx=True)
            ctx = jnp.einsum('bqk,bkd->bqd',
                             p.astype(jnp.bfloat16), v3.astype(jnp.bfloat16),
                             preferred_element_type=jnp.float32)    # (B, S, Dh)
            # fold this head straight into the output projection (no concat)
            attn = attn + mm(ctx.reshape(BS, Dh), ao_w_ref[li, h])  # (BS, H)
        attn = attn + ao_b_ref[li]
        x = layer_norm(attn + x, a_ln_g_ref[li], a_ln_b_ref[li])    # fused residual

        # ---- feed-forward ----
        hdn = mm(x, fi_w_ref[li]) + fi_b_ref[li]                    # (BS, I)
        # TODO(synk): HF RoBERTa uses exact erf-GELU; tanh approximation used here.
        c = math.sqrt(2.0 / math.pi)
        hdn = 0.5 * hdn * (1.0 + jnp.tanh(c * (hdn + 0.044715 * hdn * hdn * hdn)))
        ffn = mm(hdn, fo_w_ref[li]) + fo_b_ref[li]
        x = layer_norm(ffn + x, f_ln_g_ref[li], f_ln_b_ref[li])     # fused residual

    # ---- classification head on the [CLS] token of each example ----
    x_sc[...] = x                                                   # (BS, H) scratch
    cls = x_sc[pl.ds(0, B, stride=S), :]                            # rows 0, S, 2S, ... -> (B, H)
    hcls = jnp.tanh(mm(cls, cd_w_ref[...]) + cd_b_ref[...])
    logits = mm(hcls, co_w_ref[...]) + co_b_ref[...]                # (B, num_labels)
    logits_ref[...] = logits
    # exact softmax for the user-visible probabilities
    m = jnp.max(logits, axis=-1, keepdims=True)
    e = jnp.exp(logits - m)
    prob_ref[...] = e / jnp.sum(e, axis=-1, keepdims=True)


_PARAM_ORDER = ("word_emb", "pos_emb", "tok_type_emb",
                "emb_ln_g", "emb_ln_b",
                "qkv_w", "qkv_b", "ao_w", "ao_b", "a_ln_g", "a_ln_b",
                "fi_w", "fi_b", "fo_w", "fo_b", "f_ln_g", "f_ln_b",
                "cd_w", "cd_b", "co_w", "co_b")


def codebert_pallas(ids_col, pos_col, attn_bias, params, cfg, B):
    """One pallas_call for embeddings + encoder + classifier. Returns (logits, prob)."""
    S, H = cfg.block_size, cfg.hidden_size
    kernel = functools.partial(
        _codebert_kernel, B=B, S=S, H=H, nH=cfg.num_heads,
        V=cfg.vocab_size, P=cfg.max_position,
        num_layers=cfg.num_layers, eps=cfg.layer_norm_eps)
    return pl.pallas_call(
        kernel,
        out_shape=(jax.ShapeDtypeStruct((B, cfg.num_labels), jnp.float32),
                   jax.ShapeDtypeStruct((B, cfg.num_labels), jnp.float32)),
        scratch_shapes=[pltpu.VMEM((B * S, H), jnp.float32)],
    )(ids_col, pos_col, attn_bias, *[params[k] for k in _PARAM_ORDER])


# ----------------------------------------------------------------------------
# Parameters (stacked per-layer weights; matmul weights stored in bf16)
# ----------------------------------------------------------------------------
def init_params(cfg, key):
    H, I, L, V = cfg.hidden_size, cfg.intermediate_size, cfg.num_layers, cfg.vocab_size
    nH = cfg.num_heads
    Dh = H // nH
    keys = jax.random.split(key, 10)

    def w(k, shape):
        return jax.random.normal(k, shape, jnp.float32) * 0.02

    # RoBERTa zeroes the padding rows of both embedding tables.
    word_emb = w(keys[0], (V, H)).at[cfg.padding_idx].set(0.0)
    pos_emb = w(keys[1], (cfg.max_position, H)).at[cfg.padding_idx].set(0.0)

    # Fold the 1/sqrt(Dh) attention scale into the Q projection columns.
    qkv_w = w(keys[3], (L, H, 3 * H))
    qkv_w = qkv_w.at[:, :, :H].multiply(1.0 / math.sqrt(Dh))

    return {
        "word_emb": word_emb,                               # (V, H) f32
        "pos_emb": pos_emb,                                 # (P, H) f32
        "tok_type_emb": w(keys[2], (1, H)),                 # (1, H) f32
        "emb_ln_g": jnp.ones((1, H), jnp.float32),
        "emb_ln_b": jnp.zeros((1, H), jnp.float32),
        "qkv_w": qkv_w.astype(jnp.bfloat16),                # (L, H, 3H)
        "qkv_b": jnp.zeros((L, 1, 3 * H), jnp.float32),     # Q-bias would be scaled too; zero at init
        "ao_w": w(keys[4], (L, nH, Dh, H)).astype(jnp.bfloat16),   # per-head output projection
        "ao_b": jnp.zeros((L, 1, H), jnp.float32),
        "a_ln_g": jnp.ones((L, 1, H), jnp.float32),
        "a_ln_b": jnp.zeros((L, 1, H), jnp.float32),
        "fi_w": w(keys[5], (L, H, I)).astype(jnp.bfloat16),
        "fi_b": jnp.zeros((L, 1, I), jnp.float32),
        "fo_w": w(keys[6], (L, I, H)).astype(jnp.bfloat16),
        "fo_b": jnp.zeros((L, 1, H), jnp.float32),
        "f_ln_g": jnp.ones((L, 1, H), jnp.float32),
        "f_ln_b": jnp.zeros((L, 1, H), jnp.float32),
        "cd_w": w(keys[7], (H, H)).astype(jnp.bfloat16),
        "cd_b": jnp.zeros((1, H), jnp.float32),
        "co_w": w(keys[8], (H, cfg.num_labels)).astype(jnp.bfloat16),
        "co_b": jnp.zeros((1, cfg.num_labels), jnp.float32),
    }


# ----------------------------------------------------------------------------
# Forward (glue: only position-id cumsum / mask bias; everything else in-kernel)
# ----------------------------------------------------------------------------
def codebert_forward(params, cfg, input_ids, labels=None):
    B, S = input_ids.shape

    # position ids exactly as in CodeBERT.forward
    mask = (input_ids != cfg.padding_idx).astype(jnp.int32)
    position_ids = (jnp.cumsum(mask, axis=1) * mask + cfg.padding_idx).astype(jnp.int32)

    # attn_mask = input_ids.ne(1) -> additive bias over key positions, (B, 1, S)
    attn_bias = ((input_ids == 1).astype(jnp.float32) * -1e9).reshape(B, 1, S)

    ids_col = input_ids.reshape(B * S, 1).astype(jnp.int32)
    pos_col = position_ids.reshape(B * S, 1)

    # fused embeddings + encoder + classifier + softmax (dropout: eval -> identity)
    logits, prob = codebert_pallas(ids_col, pos_col, attn_bias, params, cfg, B)

    if labels is not None:
        log_z = jax.scipy.special.logsumexp(logits, axis=-1)
        picked = jnp.take_along_axis(logits, labels[:, None], axis=-1)[:, 0]
        loss = jnp.mean(log_z - picked)                              # CrossEntropyLoss
        return loss, prob
    return prob


if __name__ == "__main__":
    cfg = Config()
    key = jax.random.PRNGKey(0)
    kp, ki, kl = jax.random.split(key, 3)

    params = init_params(cfg, kp)

    B, S = 2, cfg.block_size
    input_ids = jax.random.randint(ki, (B, S), 2, cfg.vocab_size, dtype=jnp.int32)
    input_ids = input_ids.at[:, 0].set(0)          # CLS token
    input_ids = input_ids.at[1, -2:].set(1)        # padding tokens in second example
    labels = jax.random.randint(kl, (B,), 0, cfg.num_labels, dtype=jnp.int32)

    fwd = jax.jit(lambda p, ids, lbl: codebert_forward(p, cfg, ids, lbl))
    loss, prob = fwd(params, input_ids, labels)
    jax.block_until_ready((loss, prob))

    assert prob.shape == (B, cfg.num_labels)
    assert bool(jnp.all(jnp.isfinite(prob))) and bool(jnp.isfinite(loss))
    # exact softmax on the output -> rows sum to 1
    assert bool(jnp.allclose(jnp.sum(prob, axis=-1), 1.0, atol=1e-5))
    print("KERNEL_OK")
</pallas_src>

<mosaic_0001>
module attributes {stable_mosaic.version = 11 : i64} {
  func.func @_codebert_kernel(%arg0: memref<16x1xi32, #tpu.memory_space<vmem>>, %arg1: memref<16x1xi32, #tpu.memory_space<vmem>>, %arg2: memref<2x1x8xf32, #tpu.memory_space<vmem>>, %arg3: memref<64x32xf32, #tpu.memory_space<vmem>>, %arg4: memref<16x32xf32, #tpu.memory_space<vmem>>, %arg5: memref<1x32xf32, #tpu.memory_space<vmem>>, %arg6: memref<1x32xf32, #tpu.memory_space<vmem>>, %arg7: memref<1x32xf32, #tpu.memory_space<vmem>>, %arg8: memref<2x32x96xbf16, #tpu.memory_space<vmem>>, %arg9: memref<2x1x96xf32, #tpu.memory_space<vmem>>, %arg10: memref<2x2x16x32xbf16, #tpu.memory_space<vmem>>, %arg11: memref<2x1x32xf32, #tpu.memory_space<vmem>>, %arg12: memref<2x1x32xf32, #tpu.memory_space<vmem>>, %arg13: memref<2x1x32xf32, #tpu.memory_space<vmem>>, %arg14: memref<2x32x64xbf16, #tpu.memory_space<vmem>>, %arg15: memref<2x1x64xf32, #tpu.memory_space<vmem>>, %arg16: memref<2x64x32xbf16, #tpu.memory_space<vmem>>, %arg17: memref<2x1x32xf32, #tpu.memory_space<vmem>>, %arg18: memref<2x1x32xf32, #tpu.memory_space<vmem>>, %arg19: memref<2x1x32xf32, #tpu.memory_space<vmem>>, %arg20: memref<32x32xbf16, #tpu.memory_space<vmem>>, %arg21: memref<1x32xf32, #tpu.memory_space<vmem>>, %arg22: memref<32x4xbf16, #tpu.memory_space<vmem>>, %arg23: memref<1x4xf32, #tpu.memory_space<vmem>>, %arg24: memref<2x4xf32, #tpu.memory_space<vmem>>, %arg25: memref<2x4xf32, #tpu.memory_space<vmem>>, %arg26: memref<16x32xf32, #tpu.memory_space<vmem>>) attributes {dimension_semantics = [], scalar_prefetch = 0 : i64, scratch_operands = 1 : i64, tpu.core_type = #tpu.core_type<tc>} {
    %c0 = arith.constant 0 : index
    %c0_0 = arith.constant 0 : index
    %0 = vector.load %arg0[%c0, %c0_0] : memref<16x1xi32, #tpu.memory_space<vmem>>, vector<16x1xi32>
    %c0_1 = arith.constant 0 : index
    %c0_2 = arith.constant 0 : index
    %1 = vector.load %arg1[%c0_1, %c0_2] : memref<16x1xi32, #tpu.memory_space<vmem>>, vector<16x1xi32>
    %2 = tpu.iota {dimensions = array<i32: 1>} : vector<16x64xi32>
    %3 = vector.broadcast %0 : vector<16x1xi32> to vector<16x64xi32>
    %4 = arith.cmpi eq, %2, %3 : vector<16x64xi32>
    %5 = arith.extui %4 : vector<16x64xi1> to vector<16x64xi32>
    %6 = arith.sitofp %5 : vector<16x64xi32> to vector<16x64xf32>
    %7 = tpu.iota {dimensions = array<i32: 1>} : vector<16x16xi32>
    %8 = vector.broadcast %1 : vector<16x1xi32> to vector<16x16xi32>
    %9 = arith.cmpi eq, %7, %8 : vector<16x16xi32>
    %10 = arith.extui %9 : vector<16x16xi1> to vector<16x16xi32>
    %11 = arith.sitofp %10 : vector<16x16xi32> to vector<16x16xf32>
    %c0_3 = arith.constant 0 : index
    %c0_4 = arith.constant 0 : index
    %12 = vector.load %arg3[%c0_3, %c0_4] : memref<64x32xf32, #tpu.memory_space<vmem>>, vector<64x32xf32>
    %cst = arith.constant dense<0.000000e+00> : vector<16x32xf32>
    %13 = tpu.matmul %6, %12, %cst {dimension_numbers = #tpu.dot_dimension_numbers<[1], [0], [0], [1], [0, 0, 1, 1], [], []>} : vector<16x64xf32>, vector<64x32xf32>, vector<16x32xf32> -> vector<16x32xf32>
    %c0_5 = arith.constant 0 : index
    %c0_6 = arith.constant 0 : index
    %14 = vector.load %arg4[%c0_5, %c0_6] : memref<16x32xf32, #tpu.memory_space<vmem>>, vector<16x32xf32>
    %cst_7 = arith.constant dense<0.000000e+00> : vector<16x32xf32>
    %15 = tpu.matmul %11, %14, %cst_7 {dimension_numbers = #tpu.dot_dimension_numbers<[1], [0], [0], [1], [0, 0, 1, 1], [], []>} : vector<16x16xf32>, vector<16x32xf32>, vector<16x32xf32> -> vector<16x32xf32>
    %16 = arith.addf %13, %15 : vector<16x32xf32>
    %c0_8 = arith.constant 0 : index
    %c0_9 = arith.constant 0 : index
    %17 = vector.load %arg5[%c0_8, %c0_9] : memref<1x32xf32, #tpu.memory_space<vmem>>, vector<1x32xf32>
    %18 = vector.broadcast %17 : vector<1x32xf32> to vector<16x32xf32>
    %19 = arith.addf %16, %18 : vector<16x32xf32>
    %c0_10 = arith.constant 0 : index
    %c0_11 = arith.constant 0 : index
    %20 = vector.load %arg6[%c0_10, %c0_11] : memref<1x32xf32, #tpu.memory_space<vmem>>, vector<1x32xf32>
    %c0_12 = arith.constant 0 : index
    %c0_13 = arith.constant 0 : index
    %21 = vector.load %arg7[%c0_12, %c0_13] : memref<1x32xf32, #tpu.memory_space<vmem>>, vector<1x32xf32>
    %cst_14 = arith.constant dense<0.000000e+00> : vector<16xf32>
    %22 = vector.multi_reduction <add>, %19, %cst_14 [1] : vector<16x32xf32> to vector<16xf32>
    %23 = vector.shape_cast %22 : vector<16xf32> to vector<16x1xf32>
    %cst_15 = arith.constant 3.200000e+01 : f32
    %24 = vector.broadcast %cst_15 : f32 to vector<16x1xf32>
    %25 = arith.divf %23, %24 : vector<16x1xf32>
    %26 = vector.broadcast %25 : vector<16x1xf32> to vector<16x32xf32>
    %27 = arith.subf %19, %26 : vector<16x32xf32>
    %28 = arith.mulf %27, %27 : vector<16x32xf32>
    %cst_16 = arith.constant dense<0.000000e+00> : vector<16xf32>
    %29 = vector.multi_reduction <add>, %28, %cst_16 [1] : vector<16x32xf32> to vector<16xf32>
    %30 = vector.shape_cast %29 : vector<16xf32> to vector<16x1xf32>
    %cst_17 = arith.constant 3.200000e+01 : f32
    %31 = vector.broadcast %cst_17 : f32 to vector<16x1xf32>
    %32 = arith.divf %30, %31 : vector<16x1xf32>
    %33 = vector.broadcast %25 : vector<16x1xf32> to vector<16x32xf32>
    %34 = arith.subf %19, %33 : vector<16x32xf32>
    %cst_18 = arith.constant 9.99999974E-6 : f32
    %35 = vector.broadcast %cst_18 : f32 to vector<16x1xf32>
    %36 = arith.addf %32, %35 : vector<16x1xf32>
    %37 = math.rsqrt %36 : vector<16x1xf32>
    %38 = vector.broadcast %37 : vector<16x1xf32> to vector<16x32xf32>
    %39 = arith.mulf %34, %38 : vector<16x32xf32>
    %40 = vector.broadcast %20 : vector<1x32xf32> to vector<16x32xf32>
    %41 = arith.mulf %39, %40 : vector<16x32xf32>
    %42 = vector.broadcast %21 : vector<1x32xf32> to vector<16x32xf32>
    %43 = arith.addf %41, %42 : vector<16x32xf32>
    %c0_19 = arith.constant 0 : index
    %c0_20 = arith.constant 0 : index
    %c0_21 = arith.constant 0 : index
    %44 = vector.load %arg2[%c0_19, %c0_20, %c0_21] : memref<2x1x8xf32, #tpu.memory_space<vmem>>, vector<2x1x8xf32>
    %c0_22 = arith.constant 0 : index
    %c0_23 = arith.constant 0 : index
    %c0_24 = arith.constant 0 : index
    %45 = vector.load %arg8[%c0_22, %c0_23, %c0_24] : memref<2x32x96xbf16, #tpu.memory_space<vmem>>, vector<1x32x96xbf16>
    %46 = vector.shape_cast %45 : vector<1x32x96xbf16> to vector<32x96xbf16>
    %47 = arith.truncf %43 : vector<16x32xf32> to vector<16x32xbf16>
    %cst_25 = arith.constant dense<0.000000e+00> : vector<16x96xf32>
    %48 = tpu.matmul %47, %46, %cst_25 {dimension_numbers = #tpu.dot_dimension_numbers<[1], [0], [0], [1], [0, 0, 1, 1], [], []>} : vector<16x32xbf16>, vector<32x96xbf16>, vector<16x96xf32> -> vector<16x96xf32>
    %c0_26 = arith.constant 0 : index
    %c0_27 = arith.constant 0 : index
    %c0_28 = arith.constant 0 : index
    %49 = vector.load %arg9[%c0_26, %c0_27, %c0_28] : memref<2x1x96xf32, #tpu.memory_space<vmem>>, vector<1x1x96xf32>
    %50 = vector.shape_cast %49 : vector<1x1x96xf32> to vector<1x96xf32>
    %51 = vector.broadcast %50 : vector<1x96xf32> to vector<16x96xf32>
    %52 = arith.addf %48, %51 : vector<16x96xf32>
    %cst_29 = arith.constant 0.000000e+00 : f32
    %53 = vector.broadcast %cst_29 : f32 to vector<16x32xf32>
    %54 = vector.extract_strided_slice %52 {offsets = [0, 0], sizes = [16, 16], strides = [1, 1]} : vector<16x96xf32> to vector<16x16xf32>
    %55 = vector.shape_cast %54 : vector<16x16xf32> to vector<2x8x16xf32>
    %56 = vector.extract_strided_slice %52 {offsets = [0, 32], sizes = [16, 16], strides = [1, 1]} : vector<16x96xf32> to vector<16x16xf32>
    %57 = vector.shape_cast %56 : vector<16x16xf32> to vector<2x8x16xf32>
    %58 = vector.extract_strided_slice %52 {offsets = [0, 64], sizes = [16, 16], strides = [1, 1]} : vector<16x96xf32> to vector<16x16xf32>
    %59 = vector.shape_cast %58 : vector<16x16xf32> to vector<2x8x16xf32>
    %60 = arith.truncf %55 : vector<2x8x16xf32> to vector<2x8x16xbf16>
    %61 = arith.truncf %57 : vector<2x8x16xf32> to vector<2x8x16xbf16>
    "tpu.trace_start"() <{level = 10 : i32, message = "bqd,bkd->bqk"}> : () -> ()
    %cst_30 = arith.constant dense<0.000000e+00> : vector<2x8x8xf32>
    %62 = tpu.matmul %60, %61, %cst_30 {dimension_numbers = #tpu.dot_dimension_numbers<[2], [2], [1], [1], [0, 0, 0, 1, 1, 1], [0], [0]>} : vector<2x8x16xbf16>, vector<2x8x16xbf16>, vector<2x8x8xf32> -> vector<2x8x8xf32>
    "tpu.trace_stop"() : () -> ()
    %63 = vector.broadcast %44 : vector<2x1x8xf32> to vector<2x8x8xf32>
    %64 = arith.addf %62, %63 : vector<2x8x8xf32>
    %cst_31 = arith.constant dense<0xFF800000> : vector<2x8xf32>
    %65 = vector.multi_reduction <maximumf>, %64, %cst_31 [2] : vector<2x8x8xf32> to vector<2x8xf32>
    %66 = vector.shape_cast %65 : vector<2x8xf32> to vector<2x8x1xf32>
    %67 = vector.broadcast %66 : vector<2x8x1xf32> to vector<2x8x8xf32>
    %68 = arith.subf %64, %67 : vector<2x8x8xf32>
    %69 = math.exp %68 : vector<2x8x8xf32>
    %cst_32 = arith.constant dense<0.000000e+00> : vector<2x8xf32>
    %70 = vector.multi_reduction <add>, %69, %cst_32 [2] : vector<2x8x8xf32> to vector<2x8xf32>
    %71 = vector.shape_cast %70 : vector<2x8xf32> to vector<2x8x1xf32>
    %72 = tpu.reciprocal %71 {approx = true} : vector<2x8x1xf32> -> vector<2x8x1xf32>
    %73 = vector.broadcast %72 : vector<2x8x1xf32> to vector<2x8x8xf32>
    %74 = arith.mulf %69, %73 : vector<2x8x8xf32>
    %75 = arith.truncf %74 : vector<2x8x8xf32> to vector<2x8x8xbf16>
    %76 = arith.truncf %59 : vector<2x8x16xf32> to vector<2x8x16xbf16>
    "tpu.trace_start"() <{level = 10 : i32, message = "bqk,bkd->bqd"}> : () -> ()
    %cst_33 = arith.constant dense<0.000000e+00> : vector<2x8x16xf32>
    %77 = tpu.matmul %75, %76, %cst_33 {dimension_numbers = #tpu.dot_dimension_numbers<[2], [1], [1], [2], [0, 0, 0, 1, 1, 2], [0], [0]>} : vector<2x8x8xbf16>, vector<2x8x16xbf16>, vector<2x8x16xf32> -> vector<2x8x16xf32>
    "tpu.trace_stop"() : () -> ()
    %78 = vector.shape_cast %77 : vector<2x8x16xf32> to vector<16x16xf32>
    %c0_34 = arith.constant 0 : index
    %c0_35 = arith.constant 0 : index
    %c0_36 = arith.constant 0 : index
    %c0_37 = arith.constant 0 : index
    %79 = vector.load %arg10[%c0_34, %c0_35, %c0_36, %c0_37] : memref<2x2x16x32xbf16, #tpu.memory_space<vmem>>, vector<1x1x16x32xbf16>
    %80 = vector.shape_cast %79 : vector<1x1x16x32xbf16> to vector<16x32xbf16>
    %81 = arith.truncf %78 : vector<16x16xf32> to vector<16x16xbf16>
    %cst_38 = arith.constant dense<0.000000e+00> : vector<16x32xf32>
    %82 = tpu.matmul %81, %80, %cst_38 {dimension_numbers = #tpu.dot_dimension_numbers<[1], [0], [0], [1], [0, 0, 1, 1], [], []>} : vector<16x16xbf16>, vector<16x32xbf16>, vector<16x32xf32> -> vector<16x32xf32>
    %83 = arith.addf %53, %82 : vector<16x32xf32>
    %84 = vector.extract_strided_slice %52 {offsets = [0, 16], sizes = [16, 16], strides = [1, 1]} : vector<16x96xf32> to vector<16x16xf32>
    %85 = vector.shape_cast %84 : vector<16x16xf32> to vector<2x8x16xf32>
    %86 = vector.extract_strided_slice %52 {offsets = [0, 48], sizes = [16, 16], strides = [1, 1]} : vector<16x96xf32> to vector<16x16xf32>
    %87 = vector.shape_cast %86 : vector<16x16xf32> to vector<2x8x16xf32>
    %88 = vector.extract_strided_slice %52 {offsets = [0, 80], sizes = [16, 16], strides = [1, 1]} : vector<16x96xf32> to vector<16x16xf32>
    %89 = vector.shape_cast %88 : vector<16x16xf32> to vector<2x8x16xf32>
    %90 = arith.truncf %85 : vector<2x8x16xf32> to vector<2x8x16xbf16>
    %91 = arith.truncf %87 : vector<2x8x16xf32> to vector<2x8x16xbf16>
    "tpu.trace_start"() <{level = 10 : i32, message = "bqd,bkd->bqk"}> : () -> ()
    %cst_39 = arith.constant dense<0.000000e+00> : vector<2x8x8xf32>
    %92 = tpu.matmul %90, %91, %cst_39 {dimension_numbers = #tpu.dot_dimension_numbers<[2], [2], [1], [1], [0, 0, 0, 1, 1, 1], [0], [0]>} : vector<2x8x16xbf16>, vector<2x8x16xbf16>, vector<2x8x8xf32> -> vector<2x8x8xf32>
    "tpu.trace_stop"() : () -> ()
    %93 = vector.broadcast %44 : vector<2x1x8xf32> to vector<2x8x8xf32>
    %94 = arith.addf %92, %93 : vector<2x8x8xf32>
    %cst_40 = arith.constant dense<0xFF800000> : vector<2x8xf32>
    %95 = vector.multi_reduction <maximumf>, %94, %cst_40 [2] : vector<2x8x8xf32> to vector<2x8xf32>
    %96 = vector.shape_cast %95 : vector<2x8xf32> to vector<2x8x1xf32>
    %97 = vector.broadcast %96 : vector<2x8x1xf32> to vector<2x8x8xf32>
    %98 = arith.subf %94, %97 : vector<2x8x8xf32>
    %99 = math.exp %98 : vector<2x8x8xf32>
    %cst_41 = arith.constant dense<0.000000e+00> : vector<2x8xf32>
    %100 = vector.multi_reduction <add>, %99, %cst_41 [2] : vector<2x8x8xf32> to vector<2x8xf32>
    %101 = vector.shape_cast %100 : vector<2x8xf32> to vector<2x8x1xf32>
    %102 = tpu.reciprocal %101 {approx = true} : vector<2x8x1xf32> -> vector<2x8x1xf32>
    %103 = vector.broadcast %102 : vector<2x8x1xf32> to vector<2x8x8xf32>
    %104 = arith.mulf %99, %103 : vector<2x8x8xf32>
    %105 = arith.truncf %104 : vector<2x8x8xf32> to vector<2x8x8xbf16>
    %106 = arith.truncf %89 : vector<2x8x16xf32> to vector<2x8x16xbf16>
    "tpu.trace_start"() <{level = 10 : i32, message = "bqk,bkd->bqd"}> : () -> ()
    %cst_42 = arith.constant dense<0.000000e+00> : vector<2x8x16xf32>
    %107 = tpu.matmul %105, %106, %cst_42 {dimension_numbers = #tpu.dot_dimension_numbers<[2], [1], [1], [2], [0, 0, 0, 1, 1, 2], [0], [0]>} : vector<2x8x8xbf16>, vector<2x8x16xbf16>, vector<2x8x16xf32> -> vector<2x8x16xf32>
    "tpu.trace_stop"() : () -> ()
    %108 = vector.shape_cast %107 : vector<2x8x16xf32> to vector<16x16xf32>
    %c0_43 = arith.constant 0 : index
    %c1 = arith.constant 1 : index
    %c0_44 = arith.constant 0 : index
    %c0_45 = arith.constant 0 : index
    %109 = vector.load %arg10[%c0_43, %c1, %c0_44, %c0_45] : memref<2x2x16x32xbf16, #tpu.memory_space<vmem>>, vector<1x1x16x32xbf16>
    %110 = vector.shape_cast %109 : vector<1x1x16x32xbf16> to vector<16x32xbf16>
    %111 = arith.truncf %108 : vector<16x16xf32> to vector<16x16xbf16>
    %cst_46 = arith.constant dense<0.000000e+00> : vector<16x32xf32>
    %112 = tpu.matmul %111, %110, %cst_46 {dimension_numbers = #tpu.dot_dimension_numbers<[1], [0], [0], [1], [0, 0, 1, 1], [], []>} : vector<16x16xbf16>, vector<16x32xbf16>, vector<16x32xf32> -> vector<16x32xf32>
    %113 = arith.addf %83, %112 : vector<16x32xf32>
    %c0_47 = arith.constant 0 : index
    %c0_48 = arith.constant 0 : index
    %c0_49 = arith.constant 0 : index
    %114 = vector.load %arg11[%c0_47, %c0_48, %c0_49] : memref<2x1x32xf32, #tpu.memory_space<vmem>>, vector<1x1x32xf32>
    %115 = vector.shape_cast %114 : vector<1x1x32xf32> to vector<1x32xf32>
    %116 = vector.broadcast %115 : vector<1x32xf32> to vector<16x32xf32>
    %117 = arith.addf %113, %116 : vector<16x32xf32>
    %118 = arith.addf %117, %43 : vector<16x32xf32>
    %c0_50 = arith.constant 0 : index
    %c0_51 = arith.constant 0 : index
    %c0_52 = arith.constant 0 : index
    %119 = vector.load %arg12[%c0_50, %c0_51, %c0_52] : memref<2x1x32xf32, #tpu.memory_space<vmem>>, vector<1x1x32xf32>
    %120 = vector.shape_cast %119 : vector<1x1x32xf32> to vector<1x32xf32>
    %c0_53 = arith.constant 0 : index
    %c0_54 = arith.constant 0 : index
    %c0_55 = arith.constant 0 : index
    %121 = vector.load %arg13[%c0_53, %c0_54, %c0_55] : memref<2x1x32xf32, #tpu.memory_space<vmem>>, vector<1x1x32xf32>
    %122 = vector.shape_cast %121 : vector<1x1x32xf32> to vector<1x32xf32>
    %cst_56 = arith.constant dense<0.000000e+00> : vector<16xf32>
    %123 = vector.multi_reduction <add>, %118, %cst_56 [1] : vector<16x32xf32> to vector<16xf32>
    %124 = vector.shape_cast %123 : vector<16xf32> to vector<16x1xf32>
    %cst_57 = arith.constant 3.200000e+01 : f32
    %125 = vector.broadcast %cst_57 : f32 to vector<16x1xf32>
    %126 = arith.divf %124, %125 : vector<16x1xf32>
    %127 = vector.broadcast %126 : vector<16x1xf32> to vector<16x32xf32>
    %128 = arith.subf %118, %127 : vector<16x32xf32>
    %129 = arith.mulf %128, %128 : vector<16x32xf32>
    %cst_58 = arith.constant dense<0.000000e+00> : vector<16xf32>
    %130 = vector.multi_reduction <add>, %129, %cst_58 [1] : vector<16x32xf32> to vector<16xf32>
    %131 = vector.shape_cast %130 : vector<16xf32> to vector<16x1xf32>
    %cst_59 = arith.constant 3.200000e+01 : f32
    %132 = vector.broadcast %cst_59 : f32 to vector<16x1xf32>
    %133 = arith.divf %131, %132 : vector<16x1xf32>
    %134 = vector.broadcast %126 : vector<16x1xf32> to vector<16x32xf32>
    %135 = arith.subf %118, %134 : vector<16x32xf32>
    %cst_60 = arith.constant 9.99999974E-6 : f32
    %136 = vector.broadcast %cst_60 : f32 to vector<16x1xf32>
    %137 = arith.addf %133, %136 : vector<16x1xf32>
    %138 = math.rsqrt %137 : vector<16x1xf32>
    %139 = vector.broadcast %138 : vector<16x1xf32> to vector<16x32xf32>
    %140 = arith.mulf %135, %139 : vector<16x32xf32>
    %141 = vector.broadcast %120 : vector<1x32xf32> to vector<16x32xf32>
    %142 = arith.mulf %140, %141 : vector<16x32xf32>
    %143 = vector.broadcast %122 : vector<1x32xf32> to vector<16x32xf32>
    %144 = arith.addf %142, %143 : vector<16x32xf32>
    %c0_61 = arith.constant 0 : index
    %c0_62 = arith.constant 0 : index
    %c0_63 = arith.constant 0 : index
    %145 = vector.load %arg14[%c0_61, %c0_62, %c0_63] : memref<2x32x64xbf16, #tpu.memory_space<vmem>>, vector<1x32x64xbf16>
    %146 = vector.shape_cast %145 : vector<1x32x64xbf16> to vector<32x64xbf16>
    %147 = arith.truncf %144 : vector<16x32xf32> to vector<16x32xbf16>
    %cst_64 = arith.constant dense<0.000000e+00> : vector<16x64xf32>
    %148 = tpu.matmul %147, %146, %cst_64 {dimension_numbers = #tpu.dot_dimension_numbers<[1], [0], [0], [1], [0, 0, 1, 1], [], []>} : vector<16x32xbf16>, vector<32x64xbf16>, vector<16x64xf32> -> vector<16x64xf32>
    %c0_65 = arith.constant 0 : index
    %c0_66 = arith.constant 0 : index
    %c0_67 = arith.constant 0 : index
    %149 = vector.load %arg15[%c0_65, %c0_66, %c0_67] : memref<2x1x64xf32, #tpu.memory_space<vmem>>, vector<1x1x64xf32>
    %150 = vector.shape_cast %149 : vector<1x1x64xf32> to vector<1x64xf32>
    %151 = vector.broadcast %150 : vector<1x64xf32> to vector<16x64xf32>
    %152 = arith.addf %148, %151 : vector<16x64xf32>
    %cst_68 = arith.constant 5.000000e-01 : f32
    %153 = vector.broadcast %cst_68 : f32 to vector<16x64xf32>
    %154 = arith.mulf %153, %152 : vector<16x64xf32>
    %cst_69 = arith.constant 4.471500e-02 : f32
    %155 = vector.broadcast %cst_69 : f32 to vector<16x64xf32>
    %156 = arith.mulf %155, %152 : vector<16x64xf32>
    %157 = arith.mulf %156, %152 : vector<16x64xf32>
    %158 = arith.mulf %157, %152 : vector<16x64xf32>
    %159 = arith.addf %152, %158 : vector<16x64xf32>
    %cst_70 = arith.constant 0.797884583 : f32
    %160 = vector.broadcast %cst_70 : f32 to vector<16x64xf32>
    %161 = arith.mulf %160, %159 : vector<16x64xf32>
    %162 = math.tanh %161 : vector<16x64xf32>
    %cst_71 = arith.constant 1.000000e+00 : f32
    %163 = vector.broadcast %cst_71 : f32 to vector<16x64xf32>
    %164 = arith.addf %163, %162 : vector<16x64xf32>
    %165 = arith.mulf %154, %164 : vector<16x64xf32>
    %c0_72 = arith.constant 0 : index
    %c0_73 = arith.constant 0 : index
    %c0_74 = arith.constant 0 : index
    %166 = vector.load %arg16[%c0_72, %c0_73, %c0_74] : memref<2x64x32xbf16, #tpu.memory_space<vmem>>, vector<1x64x32xbf16>
    %167 = vector.shape_cast %166 : vector<1x64x32xbf16> to vector<64x32xbf16>
    %168 = arith.truncf %165 : vector<16x64xf32> to vector<16x64xbf16>
    %cst_75 = arith.constant dense<0.000000e+00> : vector<16x32xf32>
    %169 = tpu.matmul %168, %167, %cst_75 {dimension_numbers = #tpu.dot_dimension_numbers<[1], [0], [0], [1], [0, 0, 1, 1], [], []>} : vector<16x64xbf16>, vector<64x32xbf16>, vector<16x32xf32> -> vector<16x32xf32>
    %c0_76 = arith.constant 0 : index
    %c0_77 = arith.constant 0 : index
    %c0_78 = arith.constant 0 : index
    %170 = vector.load %arg17[%c0_76, %c0_77, %c0_78] : memref<2x1x32xf32, #tpu.memory_space<vmem>>, vector<1x1x32xf32>
    %171 = vector.shape_cast %170 : vector<1x1x32xf32> to vector<1x32xf32>
    %172 = vector.broadcast %171 : vector<1x32xf32> to vector<16x32xf32>
    %173 = arith.addf %169, %172 : vector<16x32xf32>
    %174 = arith.addf %173, %144 : vector<16x32xf32>
    %c0_79 = arith.constant 0 : index
    %c0_80 = arith.constant 0 : index
    %c0_81 = arith.constant 0 : index
    %175 = vector.load %arg18[%c0_79, %c0_80, %c0_81] : memref<2x1x32xf32, #tpu.memory_space<vmem>>, vector<1x1x32xf32>
    %176 = vector.shape_cast %175 : vector<1x1x32xf32> to vector<1x32xf32>
    %c0_82 = arith.constant 0 : index
    %c0_83 = arith.constant 0 : index
    %c0_84 = arith.constant 0 : index
    %177 = vector.load %arg19[%c0_82, %c0_83, %c0_84] : memref<2x1x32xf32, #tpu.memory_space<vmem>>, vector<1x1x32xf32>
    %178 = vector.shape_cast %177 : vector<1x1x32xf32> to vector<1x32xf32>
    %cst_85 = arith.constant dense<0.000000e+00> : vector<16xf32>
    %179 = vector.multi_reduction <add>, %174, %cst_85 [1] : vector<16x32xf32> to vector<16xf32>
    %180 = vector.shape_cast %179 : vector<16xf32> to vector<16x1xf32>
    %cst_86 = arith.constant 3.200000e+01 : f32
    %181 = vector.broadcast %cst_86 : f32 to vector<16x1xf32>
    %182 = arith.divf %180, %181 : vector<16x1xf32>
    %183 = vector.broadcast %182 : vector<16x1xf32> to vector<16x32xf32>
    %184 = arith.subf %174, %183 : vector<16x32xf32>
    %185 = arith.mulf %184, %184 : vector<16x32xf32>
    %cst_87 = arith.constant dense<0.000000e+00> : vector<16xf32>
    %186 = vector.multi_reduction <add>, %185, %cst_87 [1] : vector<16x32xf32> to vector<16xf32>
    %187 = vector.shape_cast %186 : vector<16xf32> to vector<16x1xf32>
    %cst_88 = arith.constant 3.200000e+01 : f32
    %188 = vector.broadcast %cst_88 : f32 to vector<16x1xf32>
    %189 = arith.divf %187, %188 : vector<16x1xf32>
    %190 = vector.broadcast %182 : vector<16x1xf32> to vector<16x32xf32>
    %191 = arith.subf %174, %190 : vector<16x32xf32>
    %cst_89 = arith.constant 9.99999974E-6 : f32
    %192 = vector.broadcast %cst_89 : f32 to vector<16x1xf32>
    %193 = arith.addf %189, %192 : vector<16x1xf32>
    %194 = math.rsqrt %193 : vector<16x1xf32>
    %195 = vector.broadcast %194 : vector<16x1xf32> to vector<16x32xf32>
    %196 = arith.mulf %191, %195 : vector<16x32xf32>
    %197 = vector.broadcast %176 : vector<1x32xf32> to vector<16x32xf32>
    %198 = arith.mulf %196, %197 : vector<16x32xf32>
    %199 = vector.broadcast %178 : vector<1x32xf32> to vector<16x32xf32>
    %200 = arith.addf %198, %199 : vector<16x32xf32>
    %c1_90 = arith.constant 1 : index
    %c0_91 = arith.constant 0 : index
    %c0_92 = arith.constant 0 : index
    %201 = vector.load %arg8[%c1_90, %c0_91, %c0_92] : memref<2x32x96xbf16, #tpu.memory_space<vmem>>, vector<1x32x96xbf16>
    %202 = vector.shape_cast %201 : vector<1x32x96xbf16> to vector<32x96xbf16>
    %203 = arith.truncf %200 : vector<16x32xf32> to vector<16x32xbf16>
    %cst_93 = arith.constant dense<0.000000e+00> : vector<16x96xf32>
    %204 = tpu.matmul %203, %202, %cst_93 {dimension_numbers = #tpu.dot_dimension_numbers<[1], [0], [0], [1], [0, 0, 1, 1], [], []>} : vector<16x32xbf16>, vector<32x96xbf16>, vector<16x96xf32> -> vector<16x96xf32>
    %c1_94 = arith.constant 1 : index
    %c0_95 = arith.constant 0 : index
    %c0_96 = arith.constant 0 : index
    %205 = vector.load %arg9[%c1_94, %c0_95, %c0_96] : memref<2x1x96xf32, #tpu.memory_space<vmem>>, vector<1x1x96xf32>
    %206 = vector.shape_cast %205 : vector<1x1x96xf32> to vector<1x96xf32>
    %207 = vector.broadcast %206 : vector<1x96xf32> to vector<16x96xf32>
    %208 = arith.addf %204, %207 : vector<16x96xf32>
    %cst_97 = arith.constant 0.000000e+00 : f32
    %209 = vector.broadcast %cst_97 : f32 to vector<16x32xf32>
    %210 = vector.extract_strided_slice %208 {offsets = [0, 0], sizes = [16, 16], strides = [1, 1]} : vector<16x96xf32> to vector<16x16xf32>
    %211 = vector.shape_cast %210 : vector<16x16xf32> to vector<2x8x16xf32>
    %212 = vector.extract_strided_slice %208 {offsets = [0, 32], sizes = [16, 16], strides = [1, 1]} : vector<16x96xf32> to vector<16x16xf32>
    %213 = vector.shape_cast %212 : vector<16x16xf32> to vector<2x8x16xf32>
    %214 = vector.extract_strided_slice %208 {offsets = [0, 64], sizes = [16, 16], strides = [1, 1]} : vector<16x96xf32> to vector<16x16xf32>
    %215 = vector.shape_cast %214 : vector<16x16xf32> to vector<2x8x16xf32>
    %216 = arith.truncf %211 : vector<2x8x16xf32> to vector<2x8x16xbf16>
    %217 = arith.truncf %213 : vector<2x8x16xf32> to vector<2x8x16xbf16>
    "tpu.trace_start"() <{level = 10 : i32, message = "bqd,bkd->bqk"}> : () -> ()
    %cst_98 = arith.constant dense<0.000000e+00> : vector<2x8x8xf32>
    %218 = tpu.matmul %216, %217, %cst_98 {dimension_numbers = #tpu.dot_dimension_numbers<[2], [2], [1], [1], [0, 0, 0, 1, 1, 1], [0], [0]>} : vector<2x8x16xbf16>, vector<2x8x16xbf16>, vector<2x8x8xf32> -> vector<2x8x8xf32>
    "tpu.trace_stop"() : () -> ()
    %219 = vector.broadcast %44 : vector<2x1x8xf32> to vector<2x8x8xf32>
    %220 = arith.addf %218, %219 : vector<2x8x8xf32>
    %cst_99 = arith.constant dense<0xFF800000> : vector<2x8xf32>
    %221 = vector.multi_reduction <maximumf>, %220, %cst_99 [2] : vector<2x8x8xf32> to vector<2x8xf32>
    %222 = vector.shape_cast %221 : vector<2x8xf32> to vector<2x8x1xf32>
    %223 = vector.broadcast %222 : vector<2x8x1xf32> to vector<2x8x8xf32>
    %224 = arith.subf %220, %223 : vector<2x8x8xf32>
    %225 = math.exp %224 : vector<2x8x8xf32>
    %cst_100 = arith.constant dense<0.000000e+00> : vector<2x8xf32>
    %226 = vector.multi_reduction <add>, %225, %cst_100 [2] : vector<2x8x8xf32> to vector<2x8xf32>
    %227 = vector.shape_cast %226 : vector<2x8xf32> to vector<2x8x1xf32>
    %228 = tpu.reciprocal %227 {approx = true} : vector<2x8x1xf32> -> vector<2x8x1xf32>
    %229 = vector.broadcast %228 : vector<2x8x1xf32> to vector<2x8x8xf32>
    %230 = arith.mulf %225, %229 : vector<2x8x8xf32>
    %231 = arith.truncf %230 : vector<2x8x8xf32> to vector<2x8x8xbf16>
    %232 = arith.truncf %215 : vector<2x8x16xf32> to vector<2x8x16xbf16>
    "tpu.trace_start"() <{level = 10 : i32, message = "bqk,bkd->bqd"}> : () -> ()
    %cst_101 = arith.constant dense<0.000000e+00> : vector<2x8x16xf32>
    %233 = tpu.matmul %231, %232, %cst_101 {dimension_numbers = #tpu.dot_dimension_numbers<[2], [1], [1], [2], [0, 0, 0, 1, 1, 2], [0], [0]>} : vector<2x8x8xbf16>, vector<2x8x16xbf16>, vector<2x8x16xf32> -> vector<2x8x16xf32>
    "tpu.trace_stop"() : () -> ()
    %234 = vector.shape_cast %233 : vector<2x8x16xf32> to vector<16x16xf32>
    %c1_102 = arith.constant 1 : index
    %c0_103 = arith.constant 0 : index
    %c0_104 = arith.constant 0 : index
    %c0_105 = arith.constant 0 : index
    %235 = vector.load %arg10[%c1_102, %c0_103, %c0_104, %c0_105] : memref<2x2x16x32xbf16, #tpu.memory_space<vmem>>, vector<1x1x16x32xbf16>
    %236 = vector.shape_cast %235 : vector<1x1x16x32xbf16> to vector<16x32xbf16>
    %237 = arith.truncf %234 : vector<16x16xf32> to vector<16x16xbf16>
    %cst_106 = arith.constant dense<0.000000e+00> : vector<16x32xf32>
    %238 = tpu.matmul %237, %236, %cst_106 {dimension_numbers = #tpu.dot_dimension_numbers<[1], [0], [0], [1], [0, 0, 1, 1], [], []>} : vector<16x16xbf16>, vector<16x32xbf16>, vector<16x32xf32> -> vector<16x32xf32>
    %239 = arith.addf %209, %238 : vector<16x32xf32>
    %240 = vector.extract_strided_slice %208 {offsets = [0, 16], sizes = [16, 16], strides = [1, 1]} : vector<16x96xf32> to vector<16x16xf32>
    %241 = vector.shape_cast %240 : vector<16x16xf32> to vector<2x8x16xf32>
    %242 = vector.extract_strided_slice %208 {offsets = [0, 48], sizes = [16, 16], strides = [1, 1]} : vector<16x96xf32> to vector<16x16xf32>
    %243 = vector.shape_cast %242 : vector<16x16xf32> to vector<2x8x16xf32>
    %244 = vector.extract_strided_slice %208 {offsets = [0, 80], sizes = [16, 16], strides = [1, 1]} : vector<16x96xf32> to vector<16x16xf32>
    %245 = vector.shape_cast %244 : vector<16x16xf32> to vector<2x8x16xf32>
    %246 = arith.truncf %241 : vector<2x8x16xf32> to vector<2x8x16xbf16>
    %247 = arith.truncf %243 : vector<2x8x16xf32> to vector<2x8x16xbf16>
    "tpu.trace_start"() <{level = 10 : i32, message = "bqd,bkd->bqk"}> : () -> ()
    %cst_107 = arith.constant dense<0.000000e+00> : vector<2x8x8xf32>
    %248 = tpu.matmul %246, %247, %cst_107 {dimension_numbers = #tpu.dot_dimension_numbers<[2], [2], [1], [1], [0, 0, 0, 1, 1, 1], [0], [0]>} : vector<2x8x16xbf16>, vector<2x8x16xbf16>, vector<2x8x8xf32> -> vector<2x8x8xf32>
    "tpu.trace_stop"() : () -> ()
    %249 = vector.broadcast %44 : vector<2x1x8xf32> to vector<2x8x8xf32>
    %250 = arith.addf %248, %249 : vector<2x8x8xf32>
    %cst_108 = arith.constant dense<0xFF800000> : vector<2x8xf32>
    %251 = vector.multi_reduction <maximumf>, %250, %cst_108 [2] : vector<2x8x8xf32> to vector<2x8xf32>
    %252 = vector.shape_cast %251 : vector<2x8xf32> to vector<2x8x1xf32>
    %253 = vector.broadcast %252 : vector<2x8x1xf32> to vector<2x8x8xf32>
    %254 = arith.subf %250, %253 : vector<2x8x8xf32>
    %255 = math.exp %254 : vector<2x8x8xf32>
    %cst_109 = arith.constant dense<0.000000e+00> : vector<2x8xf32>
    %256 = vector.multi_reduction <add>, %255, %cst_109 [2] : vector<2x8x8xf32> to vector<2x8xf32>
    %257 = vector.shape_cast %256 : vector<2x8xf32> to vector<2x8x1xf32>
    %258 = tpu.reciprocal %257 {approx = true} : vector<2x8x1xf32> -> vector<2x8x1xf32>
    %259 = vector.broadcast %258 : vector<2x8x1xf32> to vector<2x8x8xf32>
    %260 = arith.mulf %255, %259 : vector<2x8x8xf32>
    %261 = arith.truncf %260 : vector<2x8x8xf32> to vector<2x8x8xbf16>
    %262 = arith.truncf %245 : vector<2x8x16xf32> to vector<2x8x16xbf16>
    "tpu.trace_start"() <{level = 10 : i32, message = "bqk,bkd->bqd"}> : () -> ()
    %cst_110 = arith.constant dense<0.000000e+00> : vector<2x8x16xf32>
    %263 = tpu.matmul %261, %262, %cst_110 {dimension_numbers = #tpu.dot_dimension_numbers<[2], [1], [1], [2], [0, 0, 0, 1, 1, 2], [0], [0]>} : vector<2x8x8xbf16>, vector<2x8x16xbf16>, vector<2x8x16xf32> -> vector<2x8x16xf32>
    "tpu.trace_stop"() : () -> ()
    %264 = vector.shape_cast %263 : vector<2x8x16xf32> to vector<16x16xf32>
    %c1_111 = arith.constant 1 : index
    %c1_112 = arith.constant 1 : index
    %c0_113 = arith.constant 0 : index
    %c0_114 = arith.constant 0 : index
    %265 = vector.load %arg10[%c1_111, %c1_112, %c0_113, %c0_114] : memref<2x2x16x32xbf16, #tpu.memory_space<vmem>>, vector<1x1x16x32xbf16>
    %266 = vector.shape_cast %265 : vector<1x1x16x32xbf16> to vector<16x32xbf16>
    %267 = arith.truncf %264 : vector<16x16xf32> to vector<16x16xbf16>
    %cst_115 = arith.constant dense<0.000000e+00> : vector<16x32xf32>
    %268 = tpu.matmul %267, %266, %cst_115 {dimension_numbers = #tpu.dot_dimension_numbers<[1], [0], [0], [1], [0, 0, 1, 1], [], []>} : vector<16x16xbf16>, vector<16x32xbf16>, vector<16x32xf32> -> vector<16x32xf32>
    %269 = arith.addf %239, %268 : vector<16x32xf32>
    %c1_116 = arith.constant 1 : index
    %c0_117 = arith.constant 0 : index
    %c0_118 = arith.constant 0 : index
    %270 = vector.load %arg11[%c1_116, %c0_117, %c0_118] : memref<2x1x32xf32, #tpu.memory_space<vmem>>, vector<1x1x32xf32>
    %271 = vector.shape_cast %270 : vector<1x1x32xf32> to vector<1x32xf32>
    %272 = vector.broadcast %271 : vector<1x32xf32> to vector<16x32xf32>
    %273 = arith.addf %269, %272 : vector<16x32xf32>
    %274 = arith.addf %273, %200 : vector<16x32xf32>
    %c1_119 = arith.constant 1 : index
    %c0_120 = arith.constant 0 : index
    %c0_121 = arith.constant 0 : index
    %275 = vector.load %arg12[%c1_119, %c0_120, %c0_121] : memref<2x1x32xf32, #tpu.memory_space<vmem>>, vector<1x1x32xf32>
    %276 = vector.shape_cast %275 : vector<1x1x32xf32> to vector<1x32xf32>
    %c1_122 = arith.constant 1 : index
    %c0_123 = arith.constant 0 : index
    %c0_124 = arith.constant 0 : index
    %277 = vector.load %arg13[%c1_122, %c0_123, %c0_124] : memref<2x1x32xf32, #tpu.memory_space<vmem>>, vector<1x1x32xf32>
    %278 = vector.shape_cast %277 : vector<1x1x32xf32> to vector<1x32xf32>
    %cst_125 = arith.constant dense<0.000000e+00> : vector<16xf32>
    %279 = vector.multi_reduction <add>, %274, %cst_125 [1] : vector<16x32xf32> to vector<16xf32>
    %280 = vector.shape_cast %279 : vector<16xf32> to vector<16x1xf32>
    %cst_126 = arith.constant 3.200000e+01 : f32
    %281 = vector.broadcast %cst_126 : f32 to vector<16x1xf32>
    %282 = arith.divf %280, %281 : vector<16x1xf32>
    %283 = vector.broadcast %282 : vector<16x1xf32> to vector<16x32xf32>
    %284 = arith.subf %274, %283 : vector<16x32xf32>
    %285 = arith.mulf %284, %284 : vector<16x32xf32>
    %cst_127 = arith.constant dense<0.000000e+00> : vector<16xf32>
    %286 = vector.multi_reduction <add>, %285, %cst_127 [1] : vector<16x32xf32> to vector<16xf32>
    %287 = vector.shape_cast %286 : vector<16xf32> to vector<16x1xf32>
    %cst_128 = arith.constant 3.200000e+01 : f32
    %288 = vector.broadcast %cst_128 : f32 to vector<16x1xf32>
    %289 = arith.divf %287, %288 : vector<16x1xf32>
    %290 = vector.broadcast %282 : vector<16x1xf32> to vector<16x32xf32>
    %291 = arith.subf %274, %290 : vector<16x32xf32>
    %cst_129 = arith.constant 9.99999974E-6 : f32
    %292 = vector.broadcast %cst_129 : f32 to vector<16x1xf32>
    %293 = arith.addf %289, %292 : vector<16x1xf32>
    %294 = math.rsqrt %293 : vector<16x1xf32>
    %295 = vector.broadcast %294 : vector<16x1xf32> to vector<16x32xf32>
    %296 = arith.mulf %291, %295 : vector<16x32xf32>
    %297 = vector.broadcast %276 : vector<1x32xf32> to vector<16x32xf32>
    %298 = arith.mulf %296, %297 : vector<16x32xf32>
    %299 = vector.broadcast %278 : vector<1x32xf32> to vector<16x32xf32>
    %300 = arith.addf %298, %299 : vector<16x32xf32>
    %c1_130 = arith.constant 1 : index
    %c0_131 = arith.constant 0 : index
    %c0_132 = arith.constant 0 : index
    %301 = vector.load %arg14[%c1_130, %c0_131, %c0_132] : memref<2x32x64xbf16, #tpu.memory_space<vmem>>, vector<1x32x64xbf16>
    %302 = vector.shape_cast %301 : vector<1x32x64xbf16> to vector<32x64xbf16>
    %303 = arith.truncf %300 : vector<16x32xf32> to vector<16x32xbf16>
    %cst_133 = arith.constant dense<0.000000e+00> : vector<16x64xf32>
    %304 = tpu.matmul %303, %302, %cst_133 {dimension_numbers = #tpu.dot_dimension_numbers<[1], [0], [0], [1], [0, 0, 1, 1], [], []>} : vector<16x32xbf16>, vector<32x64xbf16>, vector<16x64xf32> -> vector<16x64xf32>
    %c1_134 = arith.constant 1 : index
    %c0_135 = arith.constant 0 : index
    %c0_136 = arith.constant 0 : index
    %305 = vector.load %arg15[%c1_134, %c0_135, %c0_136] : memref<2x1x64xf32, #tpu.memory_space<vmem>>, vector<1x1x64xf32>
    %306 = vector.shape_cast %305 : vector<1x1x64xf32> to vector<1x64xf32>
    %307 = vector.broadcast %306 : vector<1x64xf32> to vector<16x64xf32>
    %308 = arith.addf %304, %307 : vector<16x64xf32>
    %cst_137 = arith.constant 5.000000e-01 : f32
    %309 = vector.broadcast %cst_137 : f32 to vector<16x64xf32>
    %310 = arith.mulf %309, %308 : vector<16x64xf32>
    %cst_138 = arith.constant 4.471500e-02 : f32
    %311 = vector.broadcast %cst_138 : f32 to vector<16x64xf32>
    %312 = arith.mulf %311, %308 : vector<16x64xf32>
    %313 = arith.mulf %312, %308 : vector<16x64xf32>
    %314 = arith.mulf %313, %308 : vector<16x64xf32>
    %315 = arith.addf %308, %314 : vector<16x64xf32>
    %cst_139 = arith.constant 0.797884583 : f32
    %316 = vector.broadcast %cst_139 : f32 to vector<16x64xf32>
    %317 = arith.mulf %316, %315 : vector<16x64xf32>
    %318 = math.tanh %317 : vector<16x64xf32>
    %cst_140 = arith.constant 1.000000e+00 : f32
    %319 = vector.broadcast %cst_140 : f32 to vector<16x64xf32>
    %320 = arith.addf %319, %318 : vector<16x64xf32>
    %321 = arith.mulf %310, %320 : vector<16x64xf32>
    %c1_141 = arith.constant 1 : index
    %c0_142 = arith.constant 0 : index
    %c0_143 = arith.constant 0 : index
    %322 = vector.load %arg16[%c1_141, %c0_142, %c0_143] : memref<2x64x32xbf16, #tpu.memory_space<vmem>>, vector<1x64x32xbf16>
    %323 = vector.shape_cast %322 : vector<1x64x32xbf16> to vector<64x32xbf16>
    %324 = arith.truncf %321 : vector<16x64xf32> to vector<16x64xbf16>
    %cst_144 = arith.constant dense<0.000000e+00> : vector<16x32xf32>
    %325 = tpu.matmul %324, %323, %cst_144 {dimension_numbers = #tpu.dot_dimension_numbers<[1], [0], [0], [1], [0, 0, 1, 1], [], []>} : vector<16x64xbf16>, vector<64x32xbf16>, vector<16x32xf32> -> vector<16x32xf32>
    %c1_145 = arith.constant 1 : index
    %c0_146 = arith.constant 0 : index
    %c0_147 = arith.constant 0 : index
    %326 = vector.load %arg17[%c1_145, %c0_146, %c0_147] : memref<2x1x32xf32, #tpu.memory_space<vmem>>, vector<1x1x32xf32>
    %327 = vector.shape_cast %326 : vector<1x1x32xf32> to vector<1x32xf32>
    %328 = vector.broadcast %327 : vector<1x32xf32> to vector<16x32xf32>
    %329 = arith.addf %325, %328 : vector<16x32xf32>
    %330 = arith.addf %329, %300 : vector<16x32xf32>
    %c1_148 = arith.constant 1 : index
    %c0_149 = arith.constant 0 : index
    %c0_150 = arith.constant 0 : index
    %331 = vector.load %arg18[%c1_148, %c0_149, %c0_150] : memref<2x1x32xf32, #tpu.memory_space<vmem>>, vector<1x1x32xf32>
    %332 = vector.shape_cast %331 : vector<1x1x32xf32> to vector<1x32xf32>
    %c1_151 = arith.constant 1 : index
    %c0_152 = arith.constant 0 : index
    %c0_153 = arith.constant 0 : index
    %333 = vector.load %arg19[%c1_151, %c0_152, %c0_153] : memref<2x1x32xf32, #tpu.memory_space<vmem>>, vector<1x1x32xf32>
    %334 = vector.shape_cast %333 : vector<1x1x32xf32> to vector<1x32xf32>
    %cst_154 = arith.constant dense<0.000000e+00> : vector<16xf32>
    %335 = vector.multi_reduction <add>, %330, %cst_154 [1] : vector<16x32xf32> to vector<16xf32>
    %336 = vector.shape_cast %335 : vector<16xf32> to vector<16x1xf32>
    %cst_155 = arith.constant 3.200000e+01 : f32
    %337 = vector.broadcast %cst_155 : f32 to vector<16x1xf32>
    %338 = arith.divf %336, %337 : vector<16x1xf32>
    %339 = vector.broadcast %338 : vector<16x1xf32> to vector<16x32xf32>
    %340 = arith.subf %330, %339 : vector<16x32xf32>
    %341 = arith.mulf %340, %340 : vector<16x32xf32>
    %cst_156 = arith.constant dense<0.000000e+00> : vector<16xf32>
    %342 = vector.multi_reduction <add>, %341, %cst_156 [1] : vector<16x32xf32> to vector<16xf32>
    %343 = vector.shape_cast %342 : vector<16xf32> to vector<16x1xf32>
    %cst_157 = arith.constant 3.200000e+01 : f32
    %344 = vector.broadcast %cst_157 : f32 to vector<16x1xf32>
    %345 = arith.divf %343, %344 : vector<16x1xf32>
    %346 = vector.broadcast %338 : vector<16x1xf32> to vector<16x32xf32>
    %347 = arith.subf %330, %346 : vector<16x32xf32>
    %cst_158 = arith.constant 9.99999974E-6 : f32
    %348 = vector.broadcast %cst_158 : f32 to vector<16x1xf32>
    %349 = arith.addf %345, %348 : vector<16x1xf32>
    %350 = math.rsqrt %349 : vector<16x1xf32>
    %351 = vector.broadcast %350 : vector<16x1xf32> to vector<16x32xf32>
    %352 = arith.mulf %347, %351 : vector<16x32xf32>
    %353 = vector.broadcast %332 : vector<1x32xf32> to vector<16x32xf32>
    %354 = arith.mulf %352, %353 : vector<16x32xf32>
    %355 = vector.broadcast %334 : vector<1x32xf32> to vector<16x32xf32>
    %356 = arith.addf %354, %355 : vector<16x32xf32>
    %c0_159 = arith.constant 0 : index
    %c0_160 = arith.constant 0 : index
    %357 = vector.load %arg26[%c0_159, %c0_160] : memref<16x32xf32, #tpu.memory_space<vmem>>, vector<16x32xf32>
    tpu.vector_store %arg26[%c0_159, %c0_160], %356 {strides = array<i32>} : memref<16x32xf32, #tpu.memory_space<vmem>>, vector<16x32xf32>,
    %c0_161 = arith.constant 0 : index
    %c0_162 = arith.constant 0 : index
    %358 = tpu.strided_load %arg26[%c0_161, %c0_162] {strides = array<i32: 8, 1>} : memref<16x32xf32, #tpu.memory_space<vmem>>, vector<2x32xf32>
    %c0_163 = arith.constant 0 : index
    %c0_164 = arith.constant 0 : index
    %359 = vector.load %arg20[%c0_163, %c0_164] : memref<32x32xbf16, #tpu.memory_space<vmem>>, vector<32x32xbf16>
    %360 = arith.truncf %358 : vector<2x32xf32> to vector<2x32xbf16>
    %cst_165 = arith.constant dense<0.000000e+00> : vector<2x32xf32>
    %361 = tpu.matmul %360, %359, %cst_165 {dimension_numbers = #tpu.dot_dimension_numbers<[1], [0], [0], [1], [0, 0, 1, 1], [], []>} : vector<2x32xbf16>, vector<32x32xbf16>, vector<2x32xf32> -> vector<2x32xf32>
    %c0_166 = arith.constant 0 : index
    %c0_167 = arith.constant 0 : index
    %362 = vector.load %arg21[%c0_166, %c0_167] : memref<1x32xf32, #tpu.memory_space<vmem>>, vector<1x32xf32>
    %363 = vector.broadcast %362 : vector<1x32xf32> to vector<2x32xf32>
    %364 = arith.addf %361, %363 : vector<2x32xf32>
    %365 = math.tanh %364 : vector<2x32xf32>
    %c0_168 = arith.constant 0 : index
    %c0_169 = arith.constant 0 : index
    %366 = vector.load %arg22[%c0_168, %c0_169] : memref<32x4xbf16, #tpu.memory_space<vmem>>, vector<32x4xbf16>
    %367 = arith.truncf %365 : vector<2x32xf32> to vector<2x32xbf16>
    %cst_170 = arith.constant dense<0.000000e+00> : vector<2x4xf32>
    %368 = tpu.matmul %367, %366, %cst_170 {dimension_numbers = #tpu.dot_dimension_numbers<[1], [0], [0], [1], [0, 0, 1, 1], [], []>} : vector<2x32xbf16>, vector<32x4xbf16>, vector<2x4xf32> -> vector<2x4xf32>
    %c0_171 = arith.constant 0 : index
    %c0_172 = arith.constant 0 : index
    %369 = vector.load %arg23[%c0_171, %c0_172] : memref<1x4xf32, #tpu.memory_space<vmem>>, vector<1x4xf32>
    %370 = vector.broadcast %369 : vector<1x4xf32> to vector<2x4xf32>
    %371 = arith.addf %368, %370 : vector<2x4xf32>
    %c0_173 = arith.constant 0 : index
    %c0_174 = arith.constant 0 : index
    %372 = vector.load %arg24[%c0_173, %c0_174] : memref<2x4xf32, #tpu.memory_space<vmem>>, vector<2x4xf32>
    tpu.vector_store %arg24[%c0_173, %c0_174], %371 {strides = array<i32>} : memref<2x4xf32, #tpu.memory_space<vmem>>, vector<2x4xf32>,
    %cst_175 = arith.constant dense<0xFF800000> : vector<2xf32>
    %373 = vector.multi_reduction <maximumf>, %371, %cst_175 [1] : vector<2x4xf32> to vector<2xf32>
    %374 = vector.shape_cast %373 : vector<2xf32> to vector<2x1xf32>
    %375 = vector.broadcast %374 : vector<2x1xf32> to vector<2x4xf32>
    %376 = arith.subf %371, %375 : vector<2x4xf32>
    %377 = math.exp %376 : vector<2x4xf32>
    %cst_176 = arith.constant dense<0.000000e+00> : vector<2xf32>
    %378 = vector.multi_reduction <add>, %377, %cst_176 [1] : vector<2x4xf32> to vector<2xf32>
    %379 = vector.shape_cast %378 : vector<2xf32> to vector<2x1xf32>
    %380 = vector.broadcast %379 : vector<2x1xf32> to vector<2x4xf32>
    %381 = arith.divf %377, %380 : vector<2x4xf32>
    %c0_177 = arith.constant 0 : index
    %c0_178 = arith.constant 0 : index
    %382 = vector.load %arg25[%c0_177, %c0_178] : memref<2x4xf32, #tpu.memory_space<vmem>>, vector<2x4xf32>
    tpu.vector_store %arg25[%c0_177, %c0_178], %381 {strides = array<i32>} : memref<2x4xf32, #tpu.memory_space<vmem>>, vector<2x4xf32>,
    return
  }
}

</mosaic_0001>

<bundles_post_ra>
// kernel: _lambda_.1
= control target key start
LH: loop header
LB: loop body
LE: loop exit
PB: predicated region body
PF: predicated region fallthrough
CT: control target
= control target key end

     0   :  { %s2330_s0 = inlined_call_operand.vmem [shape: s32[16,1], index: 0, kind: input, shape index: {}]   ;;  %s2331_s1 = inlined_call_operand.vmem [shape: s32[16,1], index: 1, kind: input, shape index: {}]   ;;  %s2332_s2 = inlined_call_operand.vmem [shape: f32[2,1,8], index: 2, kind: input, shape index: {}]   ;;  %s2333_s3 = inlined_call_operand.vmem [shape: f32[64,32], index: 3, kind: input, shape index: {}]   ;;  %s2334_s4 = inlined_call_operand.vmem [shape: f32[16,32], index: 4, kind: input, shape index: {}]   ;;  %s2335_s5 = inlined_call_operand.vmem [shape: f32[1,32], index: 5, kind: input, shape index: {}]   ;;  %s2336_s6 = inlined_call_operand.vmem [shape: f32[1,32], index: 6, kind: input, shape index: {}]   ;;  %s2337_s7 = inlined_call_operand.vmem [shape: f32[1,32], index: 7, kind: input, shape index: {}]   ;;  %s2338_s8 = inlined_call_operand.vmem [shape: bf16[2,32,96], index: 8, kind: input, shape index: {}]   ;;  %s2339_s9 = inlined_call_operand.vmem [shape: f32[2,1,96], index: 9, kind: input, shape index: {}]   ;;  %s2340_s10 = inlined_call_operand.vmem [shape: bf16[2,2,16,32], index: 10, kind: input, shape index: {}]   ;;  %s2341_s11 = inlined_call_operand.vmem [shape: f32[2,1,32], index: 11, kind: input, shape index: {}]   ;;  %s2342_s12 = inlined_call_operand.vmem [shape: f32[2,1,32], index: 12, kind: input, shape index: {}]   ;;  %s2343_s13 = inlined_call_operand.vmem [shape: f32[2,1,32], index: 13, kind: input, shape index: {}]   ;;  %s2344_s14 = inlined_call_operand.vmem [shape: bf16[2,32,64], index: 14, kind: input, shape index: {}]   ;;  %s2345_s15 = inlined_call_operand.vmem [shape: f32[2,1,64], index: 15, kind: input, shape index: {}]   ;;  %s2346_s16 = inlined_call_operand.vmem [shape: bf16[2,64,32], index: 16, kind: input, shape index: {}]   ;;  %s2347_s17 = inlined_call_operand.vmem [shape: f32[2,1,32], index: 17, kind: input, shape index: {}]   ;;  %s2348_s18 = inlined_call_operand.vmem [shape: f32[2,1,32], index: 18, kind: input, shape index: {}]   ;;  %s2349_s19 = inlined_call_operand.vmem [shape: f32[2,1,32], index: 19, kind: input, shape index: {}]   ;;  %s2350_s20 = inlined_call_operand.vmem [shape: bf16[32,32], index: 20, kind: input, shape index: {}]   ;;  %s2351_s21 = inlined_call_operand.vmem [shape: f32[1,32], index: 21, kind: input, shape index: {}]   ;;  %s2352_s22 = inlined_call_operand.vmem [shape: bf16[32,4], index: 22, kind: input, shape index: {}]   ;;  %s2353_s23 = inlined_call_operand.vmem [shape: f32[1,4], index: 23, kind: input, shape index: {}]   ;;  %s2354_s24 = inlined_call_operand.vmem [shape: f32[2,4], index: 24, kind: output, shape index: {0}]   ;;  %s2355_s25 = inlined_call_operand.hbm [shape: f32[2,4], index: 25, kind: output, shape index: {1}]  }
   0x1   :  { %2367 = sst [smem:[#allocation6_spill]] %s2330_s0 }
   0x2   :  { %2368 = sst [smem:[#allocation7_spill]] %s2331_s1 }
   0x3   :  { %2369 = sst [smem:[#allocation8_spill]] %s2332_s2 }
   0x4   :  { %2370 = sst [smem:[#allocation9_spill]] %s2333_s3 }
   0x5   :  { %2371 = sst [smem:[#allocation10_spill]] %s2334_s4 }
   0x6   :  { %2372 = sst [smem:[#allocation11_spill]] %s2335_s5 }
   0x7   :  { %2373 = sst [smem:[#allocation12_spill]] %s2336_s6 }
   0x8   :  { %2374 = sst [smem:[#allocation13_spill]] %s2337_s7 }
   0x9   :  { %2375 = sst [smem:[#allocation14_spill]] %s2338_s8 }
   0xa   :  { %2376 = sst [smem:[#allocation15_spill]] %s2339_s9 }
   0xb   :  { %s2377_s6 = sld [smem:[#allocation6_spill]]  ;;  %v1814_v2 = vmov 0  }
   0xc   :  { %1696 = vset.pattern.permute.xlu1 %v1814_v2  ;;  %1695 = vset.pattern.permute.xlu0 %v1814_v2  ;;  %s2378_s1 = sld [smem:[#allocation9_spill]] }
   0xd   :  { %s2379_s2 = sld [smem:[#allocation7_spill]] }
  0x11   :  { %v82_v0 = vld [vmem:[%s2377_s6 + $0x8] sm:$0xff]  ;;  %v81_v1 = vld [vmem:[%s2377_s6] sm:$0xff] }
  0x12   :  { %v118_v3 = vld [vmem:[%s2378_s1 + $0x38] sm:$0xff]  ;;  %91 = vperm.xlu1 %1696, %v82_v0   ;;  %88 = vperm.xlu0 %1695, %v81_v1   ;;  %v117_v4 = vld [vmem:[%s2378_s1 + $0x30] sm:$0xff]  ;;  %v116_v5 = vld [vmem:[%s2378_s1 + $0x28] sm:$0xff] }
  0x13   :  { %166 = vmatpush.msra.mxu1 %v118_v3  ;;  %v115_v6 = vld [vmem:[%s2378_s1 + $0x20] sm:$0xff]  ;;  %v84_v7 = vld [vmem:[%s2379_s2 + $0x8] sm:$0xff]  ;;  %v114_v9 = vld [vmem:[%s2378_s1 + $0x18] sm:$0xff] }
  0x14   :  { %v83_v8 = vld [vmem:[%s2379_s2] sm:$0xff]  ;;  %v113_v10 = vld [vmem:[%s2378_s1 + $0x10] sm:$0xff] }
  0x15   :  { %167 = vmatpush.msra.mxu1 %v117_v4 }
  0x17   :  { %168 = vmatpush.msra.mxu1 %v116_v5 }
  0x19   :  { %169 = vmatpush.msra.mxu1 %v115_v6 }
  0x1a   :  { %103 = vperm.xlu1 %1696, %v84_v7   ;;  %100 = vperm.xlu0 %1695, %v83_v8  }
  0x1b   :  { %170 = vmatpush.msra.mxu1 %v114_v9 }
  0x1c   :  { %31 = vsyncpa [#allocation4], 0  ;;  %v112_v11 = vld [vmem:[%s2378_s1 + $0x8] sm:$0xff]  ;;  %v111_v12 = vld [vmem:[%s2378_s1] sm:$0xff]  ;;  %s2380_s29 = sld [smem:[#allocation10_spill]]  ;;  %v85_v15 = vlaneseq  ;;  %vm151_vm0 = vcmask 523264  }
  0x1d   :  { %171 = vmatpush.msra.mxu1 %v113_v10  ;;  %v1815_v19 = vmov 0.0   ;;  %vm121_vm3 = vcmask 130048   ;;  %s2381_s7 = sld [smem:[#allocation11_spill]]  ;;  %vm189_vm6 = vcmask 261120   ;;  %v1816_v37 = vmov 32.0   ;;  %s1818_s3 = smov 96  }
  0x1e   :  { %v86_v16 = vand.u32 127, %v85_v15  ;;  %1720 = vrcp.f32 %v1816_v37  ;;  %s2382_s8 = sld [smem:[#allocation14_spill]]  ;;  %s1819_s26 = smov 80   ;;  %vm347_vm14 = vcmask 64512   ;;  %vm377_vm15 = vcmask 1043456  }
  0x1f   :  { %172 = vmatpush.msra.mxu1 %v112_v11  ;;  %s2383_s5 = sld [smem:[#allocation12_spill]]  ;;  %s2365_s0 = smov 64  }
  0x20   :  { %s2384_s2 = sld [smem:[#allocation13_spill]] }
  0x21   :  { %173 = vmatpush.msra.mxu1 %v111_v12  ;;  %s2385_s30 = sld [smem:[#allocation15_spill]] }
  0x22   :  { %v120_v13 = vld [vmem:[%s2380_s29 + $0x8] sm:$0xff]  ;;  %v119_v14 = vld [vmem:[%s2380_s29] sm:$0xff]  ;;  %s2386_s28 = sld [smem:[#allocation8_spill]]  ;;  %s2363_s29 = smov 48  }
  0x23   :  { %142 = vmatpush.msra.mxu0 %v120_v13  ;;  %v1697_v27 = vld [vmem:[%s2381_s7] ss:$0 sm:$0xff]  ;;  %s1817_s7 = smov 112  }
  0x24   :  { %v1721_v38 = vpop.eup %1720  ;;  %v1663_v54 = vld [vmem:[%s2382_s8 + $0x8] sm:$0xff]  ;;  %v1662_v56 = vld [vmem:[%s2382_s8] sm:$0xff] }
  0x25   :  { %143 = vmatpush.msra.mxu0 %v119_v14  ;;  %v197_v39 = vmul.f32 32.0, %v1721_v38  ;;  %vm201_vm7 = vweird.f32 %v1721_v38  ;;  %283 = vmatpush.bf16.msra.mxu2 %v1663_v54  ;;  %v1698_v11 = vld [vmem:[%s2383_s5] ss:$0 sm:$0xff] }
  0x27   :  { %v198_v40 = vsub.f32 1.0, %v197_v39 }
  0x29   :  { %v199_v41 = vmul.f32 %v1721_v38, %v198_v40  ;;  %284 = vmatpush.bf16.msra.mxu2 %v1662_v56 }
  0x2b   :  { %v200_v42 = vadd.f32 %v1721_v38, %v199_v41 }
  0x2d   :  { %v2004_v43 = vsel %vm201_vm7, %v1721_v38, %v200_v42  ;;  %v2061_v42 = vld [vmem:[%s2386_s28] ss:$0 sm:$0xff] }
  0x84   :  { %v89_v17 = vpop.permute.xlu0 %88  ;;  %v92_v18 = vpop.permute.xlu1 %91 }
  0x85   :  { %vm93_vm1 = vcmp.eq.s32.totalorder %v86_v16, %v89_v17  ;;  %vm94_vm2 = vcmp.eq.s32.totalorder %v86_v16, %v92_v18 }
  0x86   :  { %v1500_v20 = vsel %vm93_vm1, 1.0, %v1815_v19  ;;  %v1501_v21 = vsel %vm94_vm2, 1.0, %v1815_v19 }
  0x87   :  { %1506 = vmatmul.msk.f32.vlgmr.msra.gmra.mxu1 %vm151_vm0, %v1500_v20 }
  0x8c   :  { %v101_v22 = vpop.permute.xlu0 %100  ;;  %v104_v24 = vpop.permute.xlu1 %103 }
  0x8d   :  { %vm105_vm4 = vcmp.eq.s32.totalorder %v86_v16, %v101_v22  ;;  %vm106_vm5 = vcmp.eq.s32.totalorder %v86_v16, %v104_v24  ;;  %v1699_v16 = vld [vmem:[%s2384_s2] ss:$0 sm:$0xff] }
  0x8e   :  { %v1502_v23 = vsel %vm105_vm4, 1.0, %v1815_v19  ;;  %v1503_v25 = vsel %vm106_vm5, 1.0, %v1815_v19 }
  0x8f   :  { %1504 = vmatmul.msk.f32.vlgmr.msra.gmra.mxu0 %vm121_vm3, %v1502_v23  ;;  %1507 = vmatmul.msk.f32.gmra.mxu1 %vm151_vm0, %v1501_v21  ;;  %v1700_v21 = vld [vmem:[%s2385_s30] ss:$0 sm:$0xff] }
  0x97   :  { %1505 = vmatmul.msk.f32.gmra.mxu0 %vm121_vm3, %v1503_v25 }
 0x104   :  { %v175_v26 = vpop.f32.mrf.mxu1 }
 0x10c   :  { %v145_v28 = vpop.f32.mrf.mxu0  ;;  %v178_v32 = vpop.f32.mrf.mxu1 }
 0x10d   :  { %v176_v29 = vadd.f32 %v175_v26, %v145_v28 }
 0x10f   :  { %v185_v30 = vadd.f32 %v1697_v27, %v176_v29 }
 0x111   :  { %v190_v31 = vsel %vm189_vm6, %v185_v30, 0.0 }
 0x112   :  { %191 = vadd.xlane.f32.xlu2 %v190_v31 }
 0x114   :  { %v148_v33 = vpop.f32.mrf.mxu0 }
 0x115   :  { %v179_v34 = vadd.f32 %v178_v32, %v148_v33 }
 0x117   :  { %v186_v35 = vadd.f32 %v1697_v27, %v179_v34 }
 0x119   :  { %v193_v36 = vsel %vm189_vm6, %v186_v35, 0.0 }
 0x11a   :  { %194 = vadd.xlane.f32.xlu2 %v193_v36 }
 0x185   :  { %v192_v44 = vpop.xlane.xlu2 %191 }
 0x186   :  { %v203_v45 = vmul.f32 %v2004_v43, %v192_v44  ;;  %v2066_v44 = vld [vmem:[%s2386_s28 + $0x1] ss:$0 sm:$0xff] }
 0x188   :  { %v205_v46 = vsub.f32 %v185_v30, %v203_v45 }
 0x18a   :  { %v207_v47 = vmul.f32 %v205_v46, %v205_v46 }
 0x18c   :  { %v209_v48 = vsel %vm189_vm6, %v207_v47, 0.0 }
 0x18d   :  { %210 = vadd.xlane.f32.xlu0 %v209_v48  ;;  %v195_v49 = vpop.xlane.xlu2 %194 }
 0x18e   :  { %v204_v50 = vmul.f32 %v2004_v43, %v195_v49 }
 0x190   :  { %v206_v51 = vsub.f32 %v186_v35, %v204_v50 }
 0x192   :  { %v208_v52 = vmul.f32 %v206_v51, %v206_v51 }
 0x194   :  { %v212_v53 = vsel %vm189_vm6, %v208_v52, 0.0 }
 0x195   :  { %213 = vadd.xlane.f32.xlu1 %v212_v53 }
 0x200   :  { %v211_v55 = vpop.xlane.xlu0 %210 }
 0x201   :  { %v215_v57 = vmul.f32 %v211_v55, %v2004_v43 }
 0x203   :  { %v217_v58 = vadd.f32 1e-05, %v215_v57 }
 0x205   :  { %1722 = vrsqrt.f32 %v217_v58  ;;  %vm225_vm9 = vweird.f32 %v217_v58 }
 0x208   :  { %v214_v59 = vpop.xlane.xlu1 %213 }
 0x209   :  { %v216_v60 = vmul.f32 %v214_v59, %v2004_v43 }
 0x20b   :  { %v1723_v61 = vpop.eup %1722  ;;  %v218_v62 = vadd.f32 1e-05, %v216_v60 }
 0x20c   :  { %v220_v63 = vmul.f32 %v1723_v61, %v217_v58  ;;  %vm226_vm8 = vweird.f32 %v1723_v61 }
 0x20d   :  { %1724 = vrsqrt.f32 %v218_v62  ;;  %vm227_vm10 = vmor %vm225_vm9, %vm226_vm8  ;;  %vm235_vm12 = vweird.f32 %v218_v62 }
 0x20e   :  { %v221_v0 = vmul.f32 %v1723_v61, %v220_v63 }
 0x210   :  { %v222_v1 = vmul.f32 0.5, %v221_v0 }
 0x212   :  { %v223_v2 = vsub.f32 1.5, %v222_v1 }
 0x213   :  { %v1725_v3 = vpop.eup %1724 }
 0x214   :  { %v224_v4 = vmul.f32 %v1723_v61, %v223_v2  ;;  %v230_v5 = vmul.f32 %v1725_v3, %v218_v62  ;;  %vm236_vm11 = vweird.f32 %v1725_v3 }
 0x215   :  { %vm237_vm13 = vmor %vm235_vm12, %vm236_vm11 }
 0x216   :  { %v231_v6 = vmul.f32 %v1725_v3, %v230_v5  ;;  %v228_v7 = vsel %vm227_vm10, %v1723_v61, %v224_v4 }
 0x217   :  { %v239_v10 = vmul.f32 %v228_v7, %v205_v46 }
 0x218   :  { %v232_v8 = vmul.f32 0.5, %v231_v6 }
 0x219   :  { %v244_v15 = vmul.f32 %v1698_v11, %v239_v10 }
 0x21a   :  { %v233_v9 = vsub.f32 1.5, %v232_v8 }
 0x21b   :  { %v2024_v18 = vadd.f32 %v1699_v16, %v244_v15 }
 0x21c   :  { %v234_v12 = vmul.f32 %v1725_v3, %v233_v9 }
 0x21e   :  { %v238_v13 = vsel %vm237_vm13, %v1725_v3, %v234_v12 }
 0x21f   :  { %v240_v14 = vmul.f32 %v238_v13, %v206_v51 }
 0x221   :  { %v245_v17 = vmul.f32 %v1698_v11, %v240_v14 }
 0x223   :  { %v2026_v19 = vadd.f32 %v1699_v16, %v245_v17 }
 0x225   :  { %v257_v20 = vpack.c.bf16 %v2026_v19, %v2024_v18 }
 0x227   :  { %1516 = vmatmul.msk.bf16.vlgmr.msra.gmra.mxu2 %vm189_vm6, %v257_v20 }
 0x2aa   :  { %v286_v22 = vpop.f32.mrf.mxu2 }
 0x2ab   :  { %v287_v23 = vadd.f32 %v1700_v21, %v286_v22 }
 0x2ad   :  { %v291_v24 = vpack.c.bf16 %v287_v23, %v287_v23 }
 0x2af   :  { %v300_v25 = vunpack.c.l.b16 %v291_v24 }
 0x2b1   :  { %v2034_v26 = vpack.c.b16 %v300_v25, %v300_v25 }
 0x2b2   :  { %v288_v27 = vpop.f32.mrf.mxu2 }
 0x2b3   :  { %v289_v28 = vadd.f32 %v1700_v21, %v288_v27  ;;  %418 = vrot.lane.b32.xlu0 %v2034_v26, %s1817_s7  ;;  %302 = vrot.lane.b32.xlu2 %v2034_v26, %s1818_s3 }
 0x2b5   :  { %v292_v29 = vpack.c.bf16 %v289_v28, %v289_v28 }
 0x2b7   :  { %v324_v30 = vunpack.c.l.b16 %v292_v29 }
 0x2b9   :  { %v2040_v31 = vpack.c.b16 %v324_v30, %v324_v30 }
 0x2bb   :  { %441 = vrot.lane.b32.xlu1 %v2040_v31, %s1817_s7  ;;  %326 = vrot.lane.b32.xlu2 %v2040_v31, %s1818_s3 }
 0x2c3   :  { %420 = vrot.lane.b32.xlu2 %v2034_v26, %s1819_s26 }
 0x2cb   :  { %443 = vrot.lane.b32.xlu2 %v2040_v31, %s1819_s26 }
 0x30d   :  { %v303_v32 = vpop.permute.xlu2 %302 }
 0x30e   :  { %v308_v33 = vsel %vm121_vm3, %v303_v32, 0 }
 0x30f   :  { %317 = vmatpush.bf16.xpose.msra.mxu3 %v308_v33 }
 0x315   :  { %v327_v34 = vpop.permute.xlu2 %326 }
 0x316   :  { %1517 = vmatmul.msk.bf16.vlgmr.msra.gmra.mxu3 %vm121_vm3, %v291_v24  ;;  %v332_v35 = vsel %vm121_vm3, %v327_v34, 0 }
 0x317   :  { %341 = vmatpush.bf16.xpose.msrb.mxu0 %v332_v35 }
 0x31d   :  { %v421_v36 = vpop.permute.xlu2 %420 }
 0x31e   :  { %1518 = vmatmul.msk.bf16.vlgmr.msrb.gmra.mxu0 %vm121_vm3, %v292_v29  ;;  %v426_v37 = vsel %vm121_vm3, %v421_v36, 0 }
 0x31f   :  { %435 = vmatpush.bf16.xpose.msrb.mxu1 %v426_v37 }
 0x325   :  { %v419_v38 = vpop.permute.xlu0 %418  ;;  %v444_v39 = vpop.permute.xlu2 %443 }
 0x326   :  { %v449_v40 = vsel %vm121_vm3, %v444_v39, 0  ;;  %1521 = vmatmul.msk.bf16.vlgmr.msrb.gmra.mxu1 %vm121_vm3, %v419_v38 }
 0x327   :  { %458 = vmatpush.bf16.xpose.msra.mxu0 %v449_v40 }
 0x32d   :  { %v442_v41 = vpop.permute.xlu1 %441 }
 0x32e   :  { %1522 = vmatmul.msk.bf16.vlgmr.msra.gmra.mxu0 %vm121_vm3, %v442_v41 }
 0x399   :  { %v319_v45 = vpop.f32.mrf.mxu3 }
 0x39a   :  { %v320_v46 = vadd.f32 %v2061_v42, %v319_v45 }
 0x39b   :  { %v343_v47 = vpop.f32.mrf.mxu0 }
 0x39c   :  { %v344_v48 = vadd.f32 %v2066_v44, %v343_v47  ;;  %v348_v49 = vsel %vm347_vm14, %v320_v46, -inf }
 0x39d   :  { %349 = vmax.xlane.f32.xlu2 %v348_v49 }
 0x39e   :  { %v351_v50 = vsel %vm347_vm14, %v344_v48, -inf }
 0x39f   :  { %352 = vmax.xlane.f32.xlu0 %v351_v50 }
 0x3a1   :  { %v321_v51 = vpop.f32.mrf.mxu3 }
 0x3a3   :  { %v345_v52 = vpop.f32.mrf.mxu0  ;;  %v437_v53 = vpop.f32.mrf.mxu1 }
 0x3a4   :  { %v438_v54 = vadd.f32 %v2061_v42, %v437_v53 }
 0x3a6   :  { %v464_v55 = vsel %vm347_vm14, %v438_v54, -inf }
 0x3a7   :  { %465 = vmax.xlane.f32.xlu1 %v464_v55 }
 0x3ab   :  { %v439_v56 = vpop.f32.mrf.mxu1  ;;  %v460_v57 = vpop.f32.mrf.mxu0 }
 0x3ac   :  { %v461_v58 = vadd.f32 %v2066_v44, %v460_v57 }
 0x3ae   :  { %v467_v59 = vsel %vm347_vm14, %v461_v58, -inf }
 0x3af   :  { %468 = vmax.xlane.f32.xlu2 %v467_v59  ;;  %v1703_v59 = vld [vmem:[%s2341_s11] ss:$0 sm:$0xff] }
 0x3b3   :  { %v462_v60 = vpop.f32.mrf.mxu0 }
 0x3c0   :  { %394 = vrot.lane.b32.xlu1 %v2040_v31, %s2365_s0 }
 0x3c7   :  { %372 = vrot.lane.b32.xlu2 %v2034_v26, %s2365_s0 }
 0x410   :  { %v350_v61 = vpop.xlane.xlu2 %349 }
 0x411   :  { %v354_v62 = vsub.f32 %v320_v46, %v350_v61  ;;  %v1664_v46 = vld [vmem:[%s2340_s10] sm:$0xff] }
 0x412   :  { %v353_v0 = vpop.xlane.xlu0 %352  ;;  %573 = vmatpush.bf16.msrb.mxu0 %v1664_v46 }
 0x413   :  { %v356_v63 = vmul.f32 1.442695, %v354_v62  ;;  %v355_v5 = vsub.f32 %v344_v48, %v353_v0  ;;  %v1665_v48 = vld [vmem:[%s2340_s10 + $0x8] sm:$0xff] }
 0x414   :  { %550 = vmatpush.bf16.msra.mxu1 %v1665_v48 }
 0x415   :  { %1726 = vpow2.f32 %v356_v63  ;;  %v358_v7 = vmul.f32 1.442695, %v355_v5 }
 0x41a   :  { %v466_v1 = vpop.xlane.xlu1 %465 }
 0x41b   :  { %v1727_v2 = vpop.eup %1726  ;;  %v470_v3 = vsub.f32 %v438_v54, %v466_v1 }
 0x41c   :  { %v360_v4 = vsel %vm347_vm14, %v1727_v2, 0.0 }
 0x41d   :  { %v472_v6 = vmul.f32 1.442695, %v470_v3  ;;  %361 = vadd.xlane.f32.xlu2 %v360_v4 }
 0x41f   :  { %1728 = vpow2.f32 %v472_v6 }
 0x420   :  { %1730 = vpow2.f32 %v358_v7 }
 0x422   :  { %v469_v8 = vpop.xlane.xlu2 %468 }
 0x423   :  { %v471_v10 = vsub.f32 %v461_v58, %v469_v8 }
 0x425   :  { %v1729_v9 = vpop.eup %1728  ;;  %v474_v12 = vmul.f32 1.442695, %v471_v10 }
 0x426   :  { %v476_v11 = vsel %vm347_vm14, %v1729_v9, 0.0  ;;  %v1731_v14 = vpop.eup %1730 }
 0x427   :  { %477 = vadd.xlane.f32.xlu0 %v476_v11  ;;  %1732 = vpow2.f32 %v474_v12  ;;  %v363_v16 = vsel %vm347_vm14, %v1731_v14, 0.0 }
 0x42a   :  { %v373_v13 = vpop.permute.xlu2 %372 }
 0x42b   :  { %v379_v15 = vsel %vm377_vm15, %v373_v13, 0 }
 0x42c   :  { %388 = vmatpush.bf16.msrb.mxu2 %v379_v15 }
 0x42d   :  { %v1733_v20 = vpop.eup %1732 }
 0x42e   :  { %v479_v22 = vsel %vm347_vm14, %v1733_v20, 0.0 }
 0x42f   :  { %364 = vadd.xlane.f32.xlu0 %v363_v16 }
 0x432   :  { %v395_v17 = vpop.permute.xlu1 %394 }
 0x433   :  { %v400_v21 = vsel %vm377_vm15, %v395_v17, 0 }
 0x434   :  { %409 = vmatpush.bf16.msrb.mxu3 %v400_v21 }
 0x435   :  { %509 = vrot.lane.b32.xlu2 %v2040_v31, %s2363_s29 }
 0x437   :  { %480 = vadd.xlane.f32.xlu0 %v479_v22 }
 0x44b   :  { %488 = vrot.lane.b32.xlu0 %v2034_v26, %s2363_s29 }
 0x490   :  { %v362_v23 = vpop.xlane.xlu2 %361 }
 0x491   :  { %1734 = vrcp.f32 %v362_v23 }
 0x497   :  { %v1735_v24 = vpop.eup %1734 }
 0x498   :  { %v368_v25 = vmul.f32 %v1735_v24, %v1727_v2  ;;  %v510_v27 = vpop.permute.xlu2 %509 }
 0x499   :  { %v515_v28 = vsel %vm377_vm15, %v510_v27, 0 }
 0x49a   :  { %v478_v29 = vpop.xlane.xlu0 %477  ;;  %524 = vmatpush.bf16.msra.mxu3 %v515_v28  ;;  %v370_v30 = vpack.c.bf16 %v368_v25, %v368_v25 }
 0x49c   :  { %1519 = vmatmul.msk.bf16.vlgmr.msrb.gmra.mxu2 %vm347_vm14, %v370_v30 }
 0x4a2   :  { %v365_v32 = vpop.xlane.xlu0 %364 }
 0x4a3   :  { %1736 = vrcp.f32 %v365_v32 }
 0x4a9   :  { %v1737_v31 = vpop.eup %1736 }
 0x4aa   :  { %v369_v33 = vmul.f32 %v1737_v31, %v1731_v14  ;;  %v481_v34 = vpop.xlane.xlu0 %480 }
 0x4ab   :  { %1738 = vrcp.f32 %v481_v34 }
 0x4ac   :  { %v371_v35 = vpack.c.bf16 %v369_v33, %v369_v33  ;;  %1740 = vrcp.f32 %v478_v29 }
 0x4ae   :  { %1520 = vmatmul.msk.bf16.vlgmr.msrb.gmra.mxu3 %vm347_vm14, %v371_v35 }
 0x4b1   :  { %v1739_v26 = vpop.eup %1738 }
 0x4b2   :  { %v485_v36 = vmul.f32 %v1739_v26, %v1733_v20  ;;  %v1741_v37 = vpop.eup %1740  ;;  %v1666_v20 = vld [vmem:[%s2344_s14] sm:$0xff] }
 0x4b3   :  { %v484_v38 = vmul.f32 %v1741_v37, %v1729_v9  ;;  %v1704_v37 = vld [vmem:[%s2342_s12] ss:$0 sm:$0xff] }
 0x4b4   :  { %v487_v39 = vpack.c.bf16 %v485_v36, %v485_v36 }
 0x4b5   :  { %v486_v45 = vpack.c.bf16 %v484_v38, %v484_v38 }
 0x4bd   :  { %v489_v40 = vpop.permute.xlu0 %488 }
 0x4be   :  { %v494_v41 = vsel %vm377_vm15, %v489_v40, 0  ;;  %1524 = vmatmul.msk.bf16.vlgmr.msra.gmra.mxu3 %vm347_vm14, %v487_v39 }
 0x4bf   :  { %503 = vmatpush.bf16.msra.mxu2 %v494_v41  ;;  %v1705_v41 = vld [vmem:[%s2343_s13] ss:$0 sm:$0xff] }
 0x4c2   :  { %1523 = vmatmul.msk.bf16.vlgmr.msra.gmra.mxu2 %vm347_vm14, %v486_v45 }
 0x51f   :  { %v390_v47 = vpop.f32.mrf.mxu2 }
 0x527   :  { %v392_v49 = vpop.f32.mrf.mxu2 }
 0x531   :  { %v411_v50 = vpop.f32.mrf.mxu3 }
 0x532   :  { %v417_v51 = vpack.c.bf16 %v411_v50, %v390_v47 }
 0x534   :  { %1536 = vmatmul.msk.bf16.vlgmr.msrb.gmra.mxu0 %vm121_vm3, %v417_v51  ;;  %v1671_v51 = vld [vmem:[%s2346_s16 + $0x18] sm:$0xff] }
 0x535   :  { %744 = vmatpush.bf16.msrb.mxu3 %v1671_v51 }
 0x539   :  { %v413_v52 = vpop.f32.mrf.mxu3 }
 0x53a   :  { %v1670_v52 = vld [vmem:[%s2346_s16 + $0x10] sm:$0xff] }
 0x53b   :  { %745 = vmatpush.bf16.msrb.mxu3 %v1670_v52 }
 0x541   :  { %v526_v53 = vpop.f32.mrf.mxu3 }
 0x545   :  { %v505_v54 = vpop.f32.mrf.mxu2 }
 0x546   :  { %v533_v55 = vpack.c.bf16 %v526_v53, %v505_v54  ;;  %v1669_v53 = vld [vmem:[%s2346_s16 + $0x8] sm:$0xff]  ;;  %v1668_v54 = vld [vmem:[%s2346_s16] sm:$0xff] }
 0x547   :  { %746 = vmatpush.bf16.msrb.mxu3 %v1669_v53 }
 0x548   :  { %1531 = vmatmul.msk.bf16.vlgmr.msra.gmra.mxu1 %vm121_vm3, %v533_v55  ;;  %v1706_v55 = vld [vmem:[%s2345_s15] ss:$0 sm:$0xff] }
 0x549   :  { %v528_v56 = vpop.f32.mrf.mxu3 }
 0x54b   :  { %747 = vmatpush.bf16.msrb.mxu3 %v1668_v54 }
 0x54d   :  { %v507_v57 = vpop.f32.mrf.mxu2 }
 0x5b1   :  { %v575_v58 = vpop.f32.mrf.mxu0 }
 0x5b9   :  { %v577_v1 = vpop.f32.mrf.mxu0 }
 0x5c5   :  { %v552_v60 = vpop.f32.mrf.mxu1 }
 0x5c6   :  { %v576_v61 = vadd.f32 %v575_v58, %v552_v60 }
 0x5c8   :  { %v584_v62 = vadd.f32 %v1703_v59, %v576_v61 }
 0x5ca   :  { %v586_v63 = vadd.f32 %v584_v62, %v2024_v18 }
 0x5cc   :  { %v590_v0 = vsel %vm189_vm6, %v586_v63, 0.0 }
 0x5cd   :  { %591 = vadd.xlane.f32.xlu1 %v590_v0  ;;  %v554_v2 = vpop.f32.mrf.mxu1 }
 0x5ce   :  { %v578_v3 = vadd.f32 %v577_v1, %v554_v2 }
 0x5d0   :  { %v585_v4 = vadd.f32 %v1703_v59, %v578_v3 }
 0x5d2   :  { %v587_v5 = vadd.f32 %v585_v4, %v2026_v19  ;;  %v1667_v19 = vld [vmem:[%s2344_s14 + $0x8] sm:$0xff] }
 0x5d3   :  { %674 = vmatpush.bf16.msrb.mxu2 %v1667_v19 }
 0x5d4   :  { %v593_v6 = vsel %vm189_vm6, %v587_v5, 0.0 }
 0x5d5   :  { %594 = vadd.xlane.f32.xlu2 %v593_v6 }
 0x5d7   :  { %675 = vmatpush.bf16.msrb.mxu2 %v1666_v20 }
 0x640   :  { %v592_v7 = vpop.xlane.xlu1 %591 }
 0x641   :  { %v596_v8 = vmul.f32 %v592_v7, %v2004_v43 }
 0x643   :  { %v598_v9 = vsub.f32 %v586_v63, %v596_v8 }
 0x645   :  { %v600_v10 = vmul.f32 %v598_v9, %v598_v9 }
 0x647   :  { %v602_v11 = vsel %vm189_vm6, %v600_v10, 0.0 }
 0x648   :  { %603 = vadd.xlane.f32.xlu0 %v602_v11  ;;  %v595_v18 = vpop.xlane.xlu2 %594 }
 0x649   :  { %v597_v12 = vmul.f32 %v595_v18, %v2004_v43 }
 0x64b   :  { %v599_v13 = vsub.f32 %v587_v5, %v597_v12 }
 0x64d   :  { %v601_v14 = vmul.f32 %v599_v13, %v599_v13 }
 0x64f   :  { %v605_v15 = vsel %vm189_vm6, %v601_v14, 0.0  ;;  %v1707_v14 = vld [vmem:[%s2347_s17] ss:$0 sm:$0xff] }
 0x650   :  { %606 = vadd.xlane.f32.xlu1 %v605_v15 }
 0x6bb   :  { %v604_v16 = vpop.xlane.xlu0 %603 }
 0x6bc   :  { %v608_v17 = vmul.f32 %v604_v16, %v2004_v43 }
 0x6be   :  { %v610_v21 = vadd.f32 1e-05, %v608_v17 }
 0x6c0   :  { %1742 = vrsqrt.f32 %v610_v21  ;;  %vm618_vm2 = vweird.f32 %v610_v21 }
 0x6c3   :  { %v607_v22 = vpop.xlane.xlu1 %606 }
 0x6c4   :  { %v609_v23 = vmul.f32 %v607_v22, %v2004_v43 }
 0x6c6   :  { %v1743_v24 = vpop.eup %1742  ;;  %v611_v25 = vadd.f32 1e-05, %v609_v23 }
 0x6c7   :  { %v613_v27 = vmul.f32 %v1743_v24, %v610_v21  ;;  %vm619_vm1 = vweird.f32 %v1743_v24 }
 0x6c8   :  { %1744 = vrsqrt.f32 %v611_v25  ;;  %vm620_vm4 = vmor %vm618_vm2, %vm619_vm1  ;;  %vm628_vm7 = vweird.f32 %v611_v25 }
 0x6c9   :  { %v614_v28 = vmul.f32 %v1743_v24, %v613_v27 }
 0x6cb   :  { %v615_v29 = vmul.f32 0.5, %v614_v28 }
 0x6cd   :  { %v616_v30 = vsub.f32 1.5, %v615_v29 }
 0x6ce   :  { %v1745_v32 = vpop.eup %1744 }
 0x6cf   :  { %v617_v31 = vmul.f32 %v1743_v24, %v616_v30  ;;  %v623_v33 = vmul.f32 %v1745_v32, %v611_v25  ;;  %vm629_vm5 = vweird.f32 %v1745_v32 }
 0x6d0   :  { %vm630_vm8 = vmor %vm628_vm7, %vm629_vm5 }
 0x6d1   :  { %v624_v34 = vmul.f32 %v1745_v32, %v623_v33  ;;  %v621_v35 = vsel %vm620_vm4, %v1743_v24, %v617_v31 }
 0x6d2   :  { %v632_v38 = vmul.f32 %v621_v35, %v598_v9  ;;  %v1673_v35 = vld [vmem:[%s2382_s8 + $0x18] sm:$0xff] }
 0x6d3   :  { %v625_v26 = vmul.f32 0.5, %v624_v34  ;;  %844 = vmatpush.bf16.msrb.mxu1 %v1673_v35 }
 0x6d4   :  { %v637_v45 = vmul.f32 %v1704_v37, %v632_v38 }
 0x6d5   :  { %v626_v36 = vsub.f32 1.5, %v625_v26 }
 0x6d6   :  { %v642_v48 = vadd.f32 %v1705_v41, %v637_v45 }
 0x6d7   :  { %v627_v39 = vmul.f32 %v1745_v32, %v626_v36 }
 0x6d9   :  { %v631_v40 = vsel %vm630_vm8, %v1745_v32, %v627_v39 }
 0x6da   :  { %v633_v46 = vmul.f32 %v631_v40, %v599_v13 }
 0x6dc   :  { %v638_v47 = vmul.f32 %v1704_v37, %v633_v46  ;;  %v1672_v37 = vld [vmem:[%s2382_s8 + $0x10] sm:$0xff] }
 0x6dd   :  { %845 = vmatpush.bf16.msrb.mxu1 %v1672_v37 }
 0x6de   :  { %v643_v49 = vadd.f32 %v1705_v41, %v638_v47 }
 0x6e0   :  { %v648_v50 = vpack.c.bf16 %v643_v49, %v642_v48 }
 0x6e2   :  { %1545 = vmatmul.msk.bf16.vlgmr.msrb.gmra.mxu2 %vm189_vm6, %v648_v50 }
 0x765   :  { %v677_v56 = vpop.f32.mrf.mxu2 }
 0x766   :  { %v678_v57 = vadd.f32 %v1706_v55, %v677_v56 }
 0x768   :  { %v684_v58 = vmul.f32 0.044715, %v678_v57  ;;  %v682_v9 = vmul.f32 0.5, %v678_v57 }
 0x76a   :  { %v686_v59 = vmul.f32 %v684_v58, %v678_v57 }
 0x76c   :  { %v688_v60 = vmul.f32 %v686_v59, %v678_v57 }
 0x76d   :  { %v679_v61 = vpop.f32.mrf.mxu2 }
 0x76e   :  { %v690_v62 = vadd.f32 %v688_v60, %v678_v57  ;;  %v680_v63 = vadd.f32 %v1706_v55, %v679_v61  ;;  %v1708_v57 = vld [vmem:[%s2348_s18] ss:$0 sm:$0xff] }
 0x76f   :  { %v1709_v61 = vld [vmem:[%s2349_s19] ss:$0 sm:$0xff] }
 0x770   :  { %v685_v0 = vmul.f32 0.044715, %v680_v63  ;;  %v692_v1 = vmul.f32 0.7978846, %v690_v62  ;;  %v683_v10 = vmul.f32 0.5, %v680_v63 }
 0x772   :  { %v687_v2 = vmul.f32 %v685_v0, %v680_v63  ;;  %1746 = vtanh.f32 %v692_v1 }
 0x774   :  { %v689_v3 = vmul.f32 %v687_v2, %v680_v63 }
 0x776   :  { %v691_v4 = vadd.f32 %v689_v3, %v680_v63 }
 0x778   :  { %v693_v5 = vmul.f32 0.7978846, %v691_v4  ;;  %v1747_v6 = vpop.eup %1746  ;;  %v1710_v4 = vld [vmem:[%s2385_s30 + $0x1] ss:$0 sm:$0xff]  ;;  %s2387_s30 = smov 64  }
 0x779   :  { %v696_v7 = vadd.f32 1.0, %v1747_v6 }
 0x77a   :  { %1748 = vtanh.f32 %v693_v5 }
 0x77b   :  { %v698_v18 = vmul.f32 %v696_v7, %v682_v9 }
 0x780   :  { %v1749_v8 = vpop.eup %1748 }
 0x781   :  { %v697_v11 = vadd.f32 1.0, %v1749_v8 }
 0x783   :  { %v699_v12 = vmul.f32 %v697_v11, %v683_v10 }
 0x785   :  { %v708_v13 = vpack.c.bf16 %v699_v12, %v698_v18 }
 0x787   :  { %1562 = vmatmul.msk.bf16.vlgmr.msrb.gmra.mxu3 %vm151_vm0, %v708_v13 }
 0x80a   :  { %v749_v15 = vpop.f32.mrf.mxu3 }
 0x80b   :  { %v750_v19 = vadd.f32 %v1707_v14, %v749_v15 }
 0x80d   :  { %v754_v16 = vadd.f32 %v750_v19, %v642_v48 }
 0x80f   :  { %v758_v17 = vsel %vm189_vm6, %v754_v16, 0.0 }
 0x810   :  { %759 = vadd.xlane.f32.xlu2 %v758_v17 }
 0x812   :  { %v751_v20 = vpop.f32.mrf.mxu3 }
 0x813   :  { %v752_v21 = vadd.f32 %v1707_v14, %v751_v20 }
 0x815   :  { %v755_v22 = vadd.f32 %v752_v21, %v643_v49 }
 0x817   :  { %v761_v23 = vsel %vm189_vm6, %v755_v22, 0.0 }
 0x818   :  { %762 = vadd.xlane.f32.xlu1 %v761_v23 }
 0x883   :  { %v760_v24 = vpop.xlane.xlu2 %759 }
 0x884   :  { %v764_v25 = vmul.f32 %v760_v24, %v2004_v43 }
 0x886   :  { %v766_v27 = vsub.f32 %v754_v16, %v764_v25 }
 0x888   :  { %v768_v28 = vmul.f32 %v766_v27, %v766_v27 }
 0x88a   :  { %v770_v29 = vsel %vm189_vm6, %v768_v28, 0.0 }
 0x88b   :  { %v763_v30 = vpop.xlane.xlu1 %762  ;;  %771 = vadd.xlane.f32.xlu2 %v770_v29 }
 0x88c   :  { %v765_v32 = vmul.f32 %v763_v30, %v2004_v43 }
 0x88e   :  { %v767_v31 = vsub.f32 %v755_v22, %v765_v32 }
 0x890   :  { %v769_v33 = vmul.f32 %v767_v31, %v767_v31 }
 0x892   :  { %v773_v34 = vsel %vm189_vm6, %v769_v33, 0.0 }
 0x893   :  { %774 = vadd.xlane.f32.xlu0 %v773_v34 }
 0x8fe   :  { %v772_v26 = vpop.xlane.xlu2 %771 }
 0x8ff   :  { %v776_v36 = vmul.f32 %v772_v26, %v2004_v43 }
 0x901   :  { %v778_v38 = vadd.f32 1e-05, %v776_v36 }
 0x903   :  { %1750 = vrsqrt.f32 %v778_v38  ;;  %vm786_vm10 = vweird.f32 %v778_v38 }
 0x906   :  { %v775_v39 = vpop.xlane.xlu0 %774 }
 0x907   :  { %v777_v40 = vmul.f32 %v775_v39, %v2004_v43 }
 0x909   :  { %v1751_v41 = vpop.eup %1750  ;;  %v779_v45 = vadd.f32 1e-05, %v777_v40 }
 0x90a   :  { %v781_v46 = vmul.f32 %v1751_v41, %v778_v38  ;;  %vm787_vm9 = vweird.f32 %v1751_v41 }
 0x90b   :  { %1752 = vrsqrt.f32 %v779_v45  ;;  %vm788_vm11 = vmor %vm786_vm10, %vm787_vm9  ;;  %vm796_vm13 = vweird.f32 %v779_v45 }
 0x90c   :  { %v782_v47 = vmul.f32 %v1751_v41, %v781_v46 }
 0x90e   :  { %v783_v48 = vmul.f32 0.5, %v782_v47 }
 0x910   :  { %v784_v49 = vsub.f32 1.5, %v783_v48 }
 0x911   :  { %v1753_v50 = vpop.eup %1752 }
 0x912   :  { %v785_v51 = vmul.f32 %v1751_v41, %v784_v49  ;;  %v791_v52 = vmul.f32 %v1753_v50, %v779_v45  ;;  %vm797_vm12 = vweird.f32 %v1753_v50 }
 0x913   :  { %vm798_vm1 = vmor %vm796_vm13, %vm797_vm12  ;;  %vm1453_vm12 = vcmask 25600  }
 0x914   :  { %v792_v53 = vmul.f32 %v1753_v50, %v791_v52  ;;  %v789_v54 = vsel %vm788_vm11, %v1751_v41, %v785_v51 }
 0x915   :  { %v800_v58 = vmul.f32 %v789_v54, %v766_v27 }
 0x916   :  { %v793_v55 = vmul.f32 0.5, %v792_v53 }
 0x917   :  { %v805_v62 = vmul.f32 %v1708_v57, %v800_v58 }
 0x918   :  { %v794_v56 = vsub.f32 1.5, %v793_v55 }
 0x919   :  { %v2169_v1 = vadd.f32 %v1709_v61, %v805_v62 }
 0x91a   :  { %v795_v59 = vmul.f32 %v1753_v50, %v794_v56 }
 0x91c   :  { %v799_v60 = vsel %vm798_vm1, %v1753_v50, %v795_v59 }
 0x91d   :  { %v801_v63 = vmul.f32 %v799_v60, %v767_v31 }
 0x91f   :  { %v806_v0 = vmul.f32 %v1708_v57, %v801_v63 }
 0x921   :  { %v2171_v2 = vadd.f32 %v1709_v61, %v806_v0 }
 0x923   :  { %v817_v3 = vpack.c.bf16 %v2171_v2, %v2169_v1 }
 0x925   :  { %1576 = vmatmul.msk.bf16.vlgmr.msrb.gmra.mxu1 %vm189_vm6, %v817_v3 }
 0x9a2   :  { %v847_v5 = vpop.f32.mrf.mxu1 }
 0x9a3   :  { %v848_v6 = vadd.f32 %v1710_v4, %v847_v5 }
 0x9a5   :  { %v852_v7 = vpack.c.bf16 %v848_v6, %v848_v6 }
 0x9a7   :  { %v855_v8 = vunpack.c.l.b16 %v852_v7 }
 0x9a9   :  { %v2179_v9 = vpack.c.b16 %v855_v8, %v855_v8 }
 0x9aa   :  { %v849_v10 = vpop.f32.mrf.mxu1 }
 0x9ab   :  { %v850_v11 = vadd.f32 %v1710_v4, %v849_v10  ;;  %974 = vrot.lane.b32.xlu0 %v2179_v9, %s1819_s26  ;;  %857 = vrot.lane.b32.xlu1 %v2179_v9, %s1818_s3 }
 0x9ad   :  { %v853_v18 = vpack.c.bf16 %v850_v11, %v850_v11 }
 0x9af   :  { %v879_v12 = vunpack.c.l.b16 %v853_v18 }
 0x9b1   :  { %v2185_v13 = vpack.c.b16 %v879_v12, %v879_v12 }
 0x9b3   :  { %881 = vrot.lane.b32.xlu2 %v2185_v13, %s1818_s3  ;;  %972 = vrot.lane.b32.xlu0 %v2179_v9, %s1817_s7 }
 0x9b4   :  { %997 = vrot.lane.b32.xlu1 %v2185_v13, %s1819_s26 }
 0x9bb   :  { %995 = vrot.lane.b32.xlu2 %v2185_v13, %s1817_s7  ;;  %s2388_s7 = smov 48  }
 0xa0d   :  { %v882_v14 = vpop.permute.xlu2 %881 }
 0xa0e   :  { %v887_v15 = vsel %vm121_vm3, %v882_v14, 0 }
 0xa0f   :  { %896 = vmatpush.bf16.xpose.msra.mxu2 %v887_v15 }
 0xa15   :  { %v996_v23 = vpop.permute.xlu2 %995 }
 0xa16   :  { %1578 = vmatmul.msk.bf16.vlgmr.msra.gmra.mxu2 %vm121_vm3, %v853_v18 }
 0xa1d   :  { %v975_v19 = vpop.permute.xlu0 %974  ;;  %v858_v16 = vpop.permute.xlu1 %857 }
 0xa1e   :  { %v980_v17 = vsel %vm121_vm3, %v975_v19, 0  ;;  %v863_v20 = vsel %vm121_vm3, %v858_v16, 0 }
 0xa1f   :  { %872 = vmatpush.bf16.xpose.msra.mxu0 %v863_v20 }
 0xa25   :  { %v973_v24 = vpop.permute.xlu0 %972 }
 0xa26   :  { %v998_v21 = vpop.permute.xlu1 %997  ;;  %1577 = vmatmul.msk.bf16.vlgmr.msra.gmra.mxu0 %vm121_vm3, %v852_v7 }
 0xa27   :  { %989 = vmatpush.bf16.xpose.msrb.mxu0 %v980_v17  ;;  %v1003_v22 = vsel %vm121_vm3, %v998_v21, 0 }
 0xa28   :  { %1012 = vmatpush.bf16.xpose.msrb.mxu2 %v1003_v22 }
 0xa2f   :  { %1584 = vmatmul.msk.bf16.vlgmr.msrb.gmra.mxu2 %vm121_vm3, %v996_v23 }
 0xa36   :  { %1583 = vmatmul.msk.bf16.vlgmr.msrb.gmra.mxu0 %vm121_vm3, %v973_v24  ;;  %v1674_v24 = vld [vmem:[%s2340_s10 + $0x10] sm:$0xff] }
 0xa37   :  { %1127 = vmatpush.bf16.msra.mxu2 %v1674_v24 }
 0xa99   :  { %v898_v25 = vpop.f32.mrf.mxu2 }
 0xa9a   :  { %v899_v27 = vadd.f32 %v2066_v44, %v898_v25 }
 0xa9c   :  { %v905_v28 = vsel %vm347_vm14, %v899_v27, -inf }
 0xa9d   :  { %906 = vmax.xlane.f32.xlu0 %v905_v28 }
 0xaa1   :  { %v900_v29 = vpop.f32.mrf.mxu2 }
 0xaa3   :  { %v874_v30 = vpop.f32.mrf.mxu0 }
 0xaa4   :  { %v875_v32 = vadd.f32 %v2061_v42, %v874_v30  ;;  %v1675_v30 = vld [vmem:[%s2340_s10 + $0x18] sm:$0xff] }
 0xaa5   :  { %1104 = vmatpush.bf16.msra.mxu0 %v1675_v30  ;;  %v1679_v30 = vld [vmem:[%s2346_s16 + $0x28] sm:$0xff] }
 0xaa6   :  { %v902_v31 = vsel %vm347_vm14, %v875_v32, -inf }
 0xaa7   :  { %903 = vmax.xlane.f32.xlu1 %v902_v31 }
 0xaab   :  { %v876_v33 = vpop.f32.mrf.mxu0 }
 0xab2   :  { %v1014_v34 = vpop.f32.mrf.mxu2 }
 0xab3   :  { %v1015_v35 = vadd.f32 %v2066_v44, %v1014_v34  ;;  %v991_v26 = vpop.f32.mrf.mxu0 }
 0xab4   :  { %v992_v36 = vadd.f32 %v2061_v42, %v991_v26 }
 0xab5   :  { %v1021_v37 = vsel %vm347_vm14, %v1015_v35, -inf }
 0xab6   :  { %1022 = vmax.xlane.f32.xlu1 %v1021_v37  ;;  %v1018_v38 = vsel %vm347_vm14, %v992_v36, -inf  ;;  %v1711_v37 = vld [vmem:[%s2341_s11 + $0x1] ss:$0 sm:$0xff] }
 0xab7   :  { %1019 = vmax.xlane.f32.xlu2 %v1018_v38 }
 0xaba   :  { %v1016_v39 = vpop.f32.mrf.mxu2 }
 0xabb   :  { %v993_v40 = vpop.f32.mrf.mxu0 }
 0xacf   :  { %926 = vrot.lane.b32.xlu1 %v2179_v9, %s2387_s30  ;;  %947 = vrot.lane.b32.xlu2 %v2185_v13, %s2387_s30 }
 0xb10   :  { %v907_v41 = vpop.xlane.xlu0 %906 }
 0xb11   :  { %v909_v45 = vsub.f32 %v899_v27, %v907_v41 }
 0xb13   :  { %v912_v44 = vmul.f32 1.442695, %v909_v45 }
 0xb15   :  { %1754 = vpow2.f32 %v912_v44 }
 0xb1a   :  { %v904_v46 = vpop.xlane.xlu1 %903 }
 0xb1b   :  { %v1755_v42 = vpop.eup %1754  ;;  %v908_v47 = vsub.f32 %v875_v32, %v904_v46 }
 0xb1c   :  { %v917_v48 = vsel %vm347_vm14, %v1755_v42, 0.0 }
 0xb1d   :  { %v910_v49 = vmul.f32 1.442695, %v908_v47  ;;  %918 = vadd.xlane.f32.xlu0 %v917_v48 }
 0xb1f   :  { %1756 = vpow2.f32 %v910_v49 }
 0xb25   :  { %v1757_v50 = vpop.eup %1756 }
 0xb26   :  { %v914_v51 = vsel %vm347_vm14, %v1757_v50, 0.0 }
 0xb27   :  { %915 = vadd.xlane.f32.xlu2 %v914_v51 }
 0xb29   :  { %v1023_v52 = vpop.xlane.xlu1 %1022 }
 0xb2a   :  { %v1020_v53 = vpop.xlane.xlu2 %1019  ;;  %v1025_v55 = vsub.f32 %v1015_v35, %v1023_v52 }
 0xb2b   :  { %v1024_v54 = vsub.f32 %v992_v36, %v1020_v53 }
 0xb2c   :  { %v1028_v57 = vmul.f32 1.442695, %v1025_v55 }
 0xb2d   :  { %v1026_v56 = vmul.f32 1.442695, %v1024_v54 }
 0xb2f   :  { %1758 = vpow2.f32 %v1026_v56 }
 0xb30   :  { %1760 = vpow2.f32 %v1028_v57 }
 0xb32   :  { %v948_v58 = vpop.permute.xlu2 %947 }
 0xb33   :  { %v953_v59 = vsel %vm377_vm15, %v948_v58, 0 }
 0xb34   :  { %962 = vmatpush.bf16.msra.mxu1 %v953_v59 }
 0xb35   :  { %v1759_v60 = vpop.eup %1758 }
 0xb36   :  { %v1030_v61 = vsel %vm347_vm14, %v1759_v60, 0.0  ;;  %v1761_v62 = vpop.eup %1760 }
 0xb37   :  { %1031 = vadd.xlane.f32.xlu0 %v1030_v61  ;;  %v1033_v63 = vsel %vm347_vm14, %v1761_v62, 0.0 }
 0xb3f   :  { %1063 = vrot.lane.b32.xlu2 %v2185_v13, %s2388_s7  ;;  %1034 = vadd.xlane.f32.xlu0 %v1033_v63 }
 0xb41   :  { %v927_v0 = vpop.permute.xlu1 %926 }
 0xb42   :  { %v932_v3 = vsel %vm377_vm15, %v927_v0, 0 }
 0xb43   :  { %941 = vmatpush.bf16.msra.mxu3 %v932_v3 }
 0xb53   :  { %1042 = vrot.lane.b32.xlu0 %v2179_v9, %s2388_s7  ;;  %s1489_s7 = sshll.u32 %s2355_s25, 4  ;;  %s1490_s7 = int_to_ptr.hbm [resolvable:$true] %s1489_s7 }
 0xb90   :  { %v919_v4 = vpop.xlane.xlu0 %918 }
 0xb91   :  { %1762 = vrcp.f32 %v919_v4 }
 0xb97   :  { %v1763_v5 = vpop.eup %1762 }
 0xb98   :  { %v923_v6 = vmul.f32 %v1763_v5, %v1755_v42 }
 0xb9a   :  { %v925_v7 = vpack.c.bf16 %v923_v6, %v923_v6  ;;  %v916_v8 = vpop.xlane.xlu2 %915 }
 0xb9b   :  { %1764 = vrcp.f32 %v916_v8 }
 0xb9c   :  { %1580 = vmatmul.msk.bf16.vlgmr.msra.gmra.mxu1 %vm347_vm14, %v925_v7 }
 0xba1   :  { %v1765_v10 = vpop.eup %1764 }
 0xba2   :  { %v922_v11 = vmul.f32 %v1765_v10, %v1757_v50  ;;  %v1064_v18 = vpop.permute.xlu2 %1063 }
 0xba3   :  { %v1069_v12 = vsel %vm377_vm15, %v1064_v18, 0 }
 0xba4   :  { %v924_v13 = vpack.c.bf16 %v922_v11, %v922_v11  ;;  %1078 = vmatpush.bf16.msrb.mxu1 %v1069_v12 }
 0xba6   :  { %1579 = vmatmul.msk.bf16.vlgmr.msra.gmra.mxu3 %vm347_vm14, %v924_v13 }
 0xbaa   :  { %v1032_v14 = vpop.xlane.xlu0 %1031 }
 0xbb2   :  { %v1035_v9 = vpop.xlane.xlu0 %1034 }
 0xbb3   :  { %1766 = vrcp.f32 %v1035_v9 }
 0xbb4   :  { %1768 = vrcp.f32 %v1032_v14 }
 0xbb9   :  { %v1767_v15 = vpop.eup %1766 }
 0xbba   :  { %v1039_v19 = vmul.f32 %v1767_v15, %v1761_v62  ;;  %v1769_v17 = vpop.eup %1768  ;;  %v1676_v62 = vld [vmem:[%s2344_s14 + $0x10] sm:$0xff]  ;;  %v1712_v15 = vld [vmem:[%s2342_s12 + $0x1] ss:$0 sm:$0xff] }
 0xbbb   :  { %v1038_v20 = vmul.f32 %v1769_v17, %v1759_v60 }
 0xbbc   :  { %v1041_v16 = vpack.c.bf16 %v1039_v19, %v1039_v19 }
 0xbbd   :  { %v1040_v23 = vpack.c.bf16 %v1038_v20, %v1038_v20  ;;  %v1713_v20 = vld [vmem:[%s2343_s13 + $0x1] ss:$0 sm:$0xff] }
 0xbbe   :  { %1586 = vmatmul.msk.bf16.vlgmr.msrb.gmra.mxu1 %vm347_vm14, %v1041_v16 }
 0xbc5   :  { %v1043_v21 = vpop.permute.xlu0 %1042 }
 0xbc6   :  { %v1048_v22 = vsel %vm377_vm15, %v1043_v21, 0 }
 0xbc7   :  { %1057 = vmatpush.bf16.msrb.mxu3 %v1048_v22 }
 0xbca   :  { %1585 = vmatmul.msk.bf16.vlgmr.msrb.gmra.mxu3 %vm347_vm14, %v1040_v23 }
 0xc19   :  { %v964_v25 = vpop.f32.mrf.mxu1 }
 0xc21   :  { %v966_v27 = vpop.f32.mrf.mxu1 }
 0xc29   :  { %v943_v28 = vpop.f32.mrf.mxu3 }
 0xc2a   :  { %v971_v29 = vpack.c.bf16 %v964_v25, %v943_v28  ;;  %v1681_v28 = vld [vmem:[%s2346_s16 + $0x38] sm:$0xff] }
 0xc2b   :  { %1305 = vmatpush.bf16.msra.mxu1 %v1681_v28  ;;  %v1716_v28 = vld [vmem:[%s2348_s18 + $0x1] ss:$0 sm:$0xff] }
 0xc2c   :  { %1598 = vmatmul.msk.bf16.vlgmr.msra.gmra.mxu2 %vm121_vm3, %v971_v29  ;;  %v1680_v29 = vld [vmem:[%s2346_s16 + $0x30] sm:$0xff] }
 0xc2f   :  { %1306 = vmatpush.bf16.msra.mxu1 %v1680_v29 }
 0xc31   :  { %v945_v32 = vpop.f32.mrf.mxu3 }
 0xc32   :  { %v1678_v32 = vld [vmem:[%s2346_s16 + $0x20] sm:$0xff] }
 0xc33   :  { %1307 = vmatpush.bf16.msra.mxu1 %v1679_v30  ;;  %v1717_v30 = vld [vmem:[%s2349_s19 + $0x1] ss:$0 sm:$0xff] }
 0xc37   :  { %1308 = vmatpush.bf16.msra.mxu1 %v1678_v32 }
 0xc3b   :  { %v1080_v31 = vpop.f32.mrf.mxu1 }
 0xc43   :  { %v1082_v33 = vpop.f32.mrf.mxu1 }
 0xc4d   :  { %v1059_v34 = vpop.f32.mrf.mxu3 }
 0xc4e   :  { %v1087_v35 = vpack.c.bf16 %v1080_v31, %v1059_v34  ;;  %v1714_v31 = vld [vmem:[%s2345_s15 + $0x1] ss:$0 sm:$0xff] }
 0xc50   :  { %1593 = vmatmul.msk.bf16.vlgmr.msra.gmra.mxu0 %vm121_vm3, %v1087_v35 }
 0xc55   :  { %v1061_v26 = vpop.f32.mrf.mxu3 }
 0xcaf   :  { %v1129_v36 = vpop.f32.mrf.mxu2 }
 0xcb7   :  { %v1131_v44 = vpop.f32.mrf.mxu2 }
 0xccd   :  { %v1106_v38 = vpop.f32.mrf.mxu0 }
 0xcce   :  { %v1130_v39 = vadd.f32 %v1129_v36, %v1106_v38 }
 0xcd0   :  { %v1139_v40 = vadd.f32 %v1711_v37, %v1130_v39 }
 0xcd2   :  { %v1141_v41 = vadd.f32 %v1139_v40, %v2169_v1 }
 0xcd4   :  { %v1147_v45 = vsel %vm189_vm6, %v1141_v41, 0.0 }
 0xcd5   :  { %1148 = vadd.xlane.f32.xlu1 %v1147_v45  ;;  %v1108_v46 = vpop.f32.mrf.mxu0 }
 0xcd6   :  { %v1132_v42 = vadd.f32 %v1131_v44, %v1108_v46 }
 0xcd8   :  { %v1140_v47 = vadd.f32 %v1711_v37, %v1132_v42 }
 0xcda   :  { %v1142_v48 = vadd.f32 %v1140_v47, %v2171_v2  ;;  %v1677_v2 = vld [vmem:[%s2344_s14 + $0x18] sm:$0xff] }
 0xcdb   :  { %1233 = vmatpush.bf16.msra.mxu3 %v1677_v2 }
 0xcdc   :  { %v1150_v49 = vsel %vm189_vm6, %v1142_v48, 0.0 }
 0xcdd   :  { %1151 = vadd.xlane.f32.xlu2 %v1150_v49 }
 0xcdf   :  { %1234 = vmatpush.bf16.msra.mxu3 %v1676_v62 }
 0xd48   :  { %v1149_v50 = vpop.xlane.xlu1 %1148 }
 0xd49   :  { %v1153_v51 = vmul.f32 %v1149_v50, %v2004_v43 }
 0xd4b   :  { %v1155_v52 = vsub.f32 %v1141_v41, %v1153_v51 }
 0xd4d   :  { %v1157_v53 = vmul.f32 %v1155_v52, %v1155_v52 }
 0xd4f   :  { %v1159_v54 = vsel %vm189_vm6, %v1157_v53, 0.0 }
 0xd50   :  { %1160 = vadd.xlane.f32.xlu0 %v1159_v54  ;;  %v1152_v1 = vpop.xlane.xlu2 %1151 }
 0xd51   :  { %v1154_v55 = vmul.f32 %v1152_v1, %v2004_v43 }
 0xd53   :  { %v1156_v56 = vsub.f32 %v1142_v48, %v1154_v55  ;;  %v1715_v55 = vld [vmem:[%s2347_s17 + $0x1] ss:$0 sm:$0xff] }
 0xd55   :  { %v1158_v57 = vmul.f32 %v1156_v56, %v1156_v56 }
 0xd57   :  { %v1162_v58 = vsel %vm189_vm6, %v1158_v57, 0.0 }
 0xd58   :  { %1163 = vadd.xlane.f32.xlu1 %v1162_v58 }
 0xdc3   :  { %v1161_v59 = vpop.xlane.xlu0 %1160 }
 0xdc4   :  { %v1165_v60 = vmul.f32 %v1161_v59, %v2004_v43 }
 0xdc6   :  { %v1167_v61 = vadd.f32 1e-05, %v1165_v60 }
 0xdc8   :  { %1770 = vrsqrt.f32 %v1167_v61  ;;  %vm1175_vm14 = vweird.f32 %v1167_v61 }
 0xdcb   :  { %v1164_v63 = vpop.xlane.xlu1 %1163 }
 0xdcc   :  { %v1166_v0 = vmul.f32 %v1164_v63, %v2004_v43 }
 0xdce   :  { %v1771_v3 = vpop.eup %1770  ;;  %v1168_v4 = vadd.f32 1e-05, %v1166_v0 }
 0xdcf   :  { %v1170_v5 = vmul.f32 %v1771_v3, %v1167_v61  ;;  %vm1176_vm3 = vweird.f32 %v1771_v3 }
 0xdd0   :  { %1772 = vrsqrt.f32 %v1168_v4  ;;  %vm1177_vm15 = vmor %vm1175_vm14, %vm1176_vm3  ;;  %vm1185_vm4 = vweird.f32 %v1168_v4 }
 0xdd1   :  { %v1171_v6 = vmul.f32 %v1771_v3, %v1170_v5 }
 0xdd3   :  { %v1172_v7 = vmul.f32 0.5, %v1171_v6 }
 0xdd5   :  { %v1173_v8 = vsub.f32 1.5, %v1172_v7 }
 0xdd6   :  { %v1773_v10 = vpop.eup %1772 }
 0xdd7   :  { %v1174_v11 = vmul.f32 %v1771_v3, %v1173_v8  ;;  %v1180_v18 = vmul.f32 %v1773_v10, %v1168_v4  ;;  %vm1186_vm2 = vweird.f32 %v1773_v10 }
 0xdd8   :  { %vm1187_vm5 = vmor %vm1185_vm4, %vm1186_vm2 }
 0xdd9   :  { %v1181_v12 = vmul.f32 %v1773_v10, %v1180_v18  ;;  %v1178_v13 = vsel %vm1177_vm15, %v1771_v3, %v1174_v11 }
 0xdda   :  { %v1189_v19 = vmul.f32 %v1178_v13, %v1155_v52 }
 0xddb   :  { %v1182_v14 = vmul.f32 0.5, %v1181_v12 }
 0xddc   :  { %v1194_v21 = vmul.f32 %v1712_v15, %v1189_v19 }
 0xddd   :  { %v1183_v9 = vsub.f32 1.5, %v1182_v14  ;;  %v1683_v14 = vld [vmem:[%s2350_s20 + $0x8] sm:$0xff] }
 0xdde   :  { %v1199_v24 = vadd.f32 %v1713_v20, %v1194_v21  ;;  %1408 = vmatpush.bf16.msrb.mxu0 %v1683_v14 }
 0xddf   :  { %v1184_v16 = vmul.f32 %v1773_v10, %v1183_v9  ;;  %v1682_v9 = vld [vmem:[%s2350_s20] sm:$0xff] }
 0xde1   :  { %v1188_v17 = vsel %vm1187_vm5, %v1773_v10, %v1184_v16 }
 0xde2   :  { %v1190_v22 = vmul.f32 %v1188_v17, %v1156_v56  ;;  %1409 = vmatpush.bf16.msrb.mxu0 %v1682_v9 }
 0xde4   :  { %v1195_v23 = vmul.f32 %v1712_v15, %v1190_v22 }
 0xde6   :  { %v1200_v25 = vadd.f32 %v1713_v20, %v1195_v23 }
 0xde8   :  { %v1206_v27 = vpack.c.bf16 %v1200_v25, %v1199_v24 }
 0xdea   :  { %1615 = vmatmul.msk.bf16.vlgmr.msra.gmra.mxu3 %vm189_vm6, %v1206_v27 }
 0xe6d   :  { %v1236_v33 = vpop.f32.mrf.mxu3 }
 0xe6e   :  { %v1237_v34 = vadd.f32 %v1714_v31, %v1236_v33 }
 0xe70   :  { %v1243_v35 = vmul.f32 0.044715, %v1237_v34  ;;  %v1241_v50 = vmul.f32 0.5, %v1237_v34 }
 0xe72   :  { %v1245_v26 = vmul.f32 %v1243_v35, %v1237_v34 }
 0xe74   :  { %v1247_v36 = vmul.f32 %v1245_v26, %v1237_v34 }
 0xe75   :  { %v1238_v37 = vpop.f32.mrf.mxu3 }
 0xe76   :  { %v1249_v38 = vadd.f32 %v1247_v36, %v1237_v34  ;;  %v1239_v39 = vadd.f32 %v1714_v31, %v1238_v37 }
 0xe78   :  { %v1244_v40 = vmul.f32 0.044715, %v1239_v39  ;;  %v1251_v41 = vmul.f32 0.7978846, %v1249_v38  ;;  %v1242_v51 = vmul.f32 0.5, %v1239_v39 }
 0xe7a   :  { %v1246_v45 = vmul.f32 %v1244_v40, %v1239_v39  ;;  %1774 = vtanh.f32 %v1251_v41 }
 0xe7c   :  { %v1248_v44 = vmul.f32 %v1246_v45, %v1239_v39  ;;  %v1685_v45 = vld [vmem:[%s2352_s22 + $0x8] sm:$0xff] }
 0xe7d   :  { %1446 = vmatpush.bf16.msrb.mxu2 %v1685_v45 }
 0xe7e   :  { %v1250_v46 = vadd.f32 %v1248_v44, %v1239_v39  ;;  %v1684_v44 = vld [vmem:[%s2352_s22] sm:$0xff] }
 0xe80   :  { %v1252_v42 = vmul.f32 0.7978846, %v1250_v46  ;;  %v1775_v47 = vpop.eup %1774  ;;  %v1718_v46 = vld [vmem:[%s2351_s21] ss:$0 sm:$0xff] }
 0xe81   :  { %v1255_v48 = vadd.f32 1.0, %v1775_v47  ;;  %1447 = vmatpush.bf16.msrb.mxu2 %v1684_v44 }
 0xe82   :  { %1776 = vtanh.f32 %v1252_v42 }
 0xe83   :  { %v1257_v53 = vmul.f32 %v1255_v48, %v1241_v50 }
 0xe88   :  { %v1777_v49 = vpop.eup %1776 }
 0xe89   :  { %v1256_v52 = vadd.f32 1.0, %v1777_v49 }
 0xe8b   :  { %v1258_v54 = vmul.f32 %v1256_v52, %v1242_v51  ;;  %v1719_v51 = vld [vmem:[%s2353_s23] ss:$0 sm:$0xff]  ;;  %s1822_s23 = smov [#allocation3]  }
 0xe8d   :  { %v1268_v1 = vpack.c.bf16 %v1258_v54, %v1257_v53 }
 0xe8f   :  { %1641 = vmatmul.msk.bf16.vlgmr.msra.gmra.mxu1 %vm151_vm0, %v1268_v1 }
 0xf0c   :  { %v1310_v56 = vpop.f32.mrf.mxu1 }
 0xf0d   :  { %v1311_v57 = vadd.f32 %v1715_v55, %v1310_v56 }
 0xf0f   :  { %v1315_v58 = vadd.f32 %v1311_v57, %v1199_v24 }
 0xf11   :  { %v1321_v2 = vsel %vm189_vm6, %v1315_v58, 0.0 }
 0xf12   :  { %1322 = vadd.xlane.f32.xlu2 %v1321_v2 }
 0xf14   :  { %v1312_v59 = vpop.f32.mrf.mxu1 }
 0xf15   :  { %v1313_v60 = vadd.f32 %v1715_v55, %v1312_v59 }
 0xf17   :  { %v1316_v61 = vadd.f32 %v1313_v60, %v1200_v25 }
 0xf19   :  { %v1324_v62 = vsel %vm189_vm6, %v1316_v61, 0.0 }
 0xf1a   :  { %1325 = vadd.xlane.f32.xlu1 %v1324_v62 }
 0xf85   :  { %v1323_v63 = vpop.xlane.xlu2 %1322 }
 0xf86   :  { %v1327_v0 = vmul.f32 %v1323_v63, %v2004_v43 }
 0xf88   :  { %v1329_v3 = vsub.f32 %v1315_v58, %v1327_v0 }
 0xf8a   :  { %v1331_v4 = vmul.f32 %v1329_v3, %v1329_v3 }
 0xf8c   :  { %v1333_v5 = vsel %vm189_vm6, %v1331_v4, 0.0 }
 0xf8d   :  { %v1326_v6 = vpop.xlane.xlu1 %1325  ;;  %1334 = vadd.xlane.f32.xlu0 %v1333_v5 }
 0xf8e   :  { %v1328_v7 = vmul.f32 %v1326_v6, %v2004_v43 }
 0xf90   :  { %v1330_v8 = vsub.f32 %v1316_v61, %v1328_v7 }
 0xf92   :  { %v1332_v10 = vmul.f32 %v1330_v8, %v1330_v8 }
 0xf94   :  { %v1336_v11 = vsel %vm189_vm6, %v1332_v10, 0.0 }
 0xf95   :  { %1337 = vadd.xlane.f32.xlu2 %v1336_v11 }
0x1000   :  { %v1335_v18 = vpop.xlane.xlu0 %1334 }
0x1001   :  { %v1339_v12 = vmul.f32 %v1335_v18, %v2004_v43 }
0x1003   :  { %v1341_v13 = vadd.f32 1e-05, %v1339_v12 }
0x1005   :  { %1778 = vrsqrt.f32 %v1341_v13  ;;  %vm1349_vm7 = vweird.f32 %v1341_v13 }
0x1008   :  { %v1338_v15 = vpop.xlane.xlu2 %1337 }
0x1009   :  { %v1340_v19 = vmul.f32 %v1338_v15, %v2004_v43 }
0x100b   :  { %v1779_v16 = vpop.eup %1778  ;;  %v1342_v17 = vadd.f32 1e-05, %v1340_v19 }
0x100c   :  { %v1344_v20 = vmul.f32 %v1779_v16, %v1341_v13  ;;  %vm1350_vm0 = vweird.f32 %v1779_v16 }
0x100d   :  { %1780 = vrsqrt.f32 %v1342_v17  ;;  %vm1351_vm8 = vmor %vm1349_vm7, %vm1350_vm0  ;;  %vm1359_vm10 = vweird.f32 %v1342_v17 }
0x100e   :  { %v1345_v21 = vmul.f32 %v1779_v16, %v1344_v20 }
0x1010   :  { %v1346_v22 = vmul.f32 0.5, %v1345_v21 }
0x1012   :  { %v1347_v23 = vsub.f32 1.5, %v1346_v22 }
0x1013   :  { %v1781_v24 = vpop.eup %1780 }
0x1014   :  { %v1348_v25 = vmul.f32 %v1779_v16, %v1347_v23  ;;  %v1354_v27 = vmul.f32 %v1781_v24, %v1342_v17  ;;  %vm1360_vm9 = vweird.f32 %v1781_v24 }
0x1015   :  { %vm1361_vm11 = vmor %vm1359_vm10, %vm1360_vm9 }
0x1016   :  { %v1352_v29 = vsel %vm1351_vm8, %v1779_v16, %v1348_v25  ;;  %v1355_v43 = vmul.f32 %v1781_v24, %v1354_v27 }
0x1017   :  { %v1363_v32 = vmul.f32 %v1352_v29, %v1329_v3 }
0x1018   :  { %v1356_v31 = vmul.f32 0.5, %v1355_v43 }
0x1019   :  { %v1368_v33 = vmul.f32 %v1716_v28, %v1363_v32 }
0x101a   :  { %v1357_v34 = vsub.f32 1.5, %v1356_v31 }
0x101b   :  { %v1373_v35 = vadd.f32 %v1717_v30, %v1368_v33 }
0x101c   :  { %v1358_v26 = vmul.f32 %v1781_v24, %v1357_v34 }
0x101d   :  { %1375 = vst.msk [vmem:[#allocation2] sm:$0xff] %vm189_vm6, %v1373_v35 }
0x101e   :  { %v1362_v36 = vsel %vm1361_vm11, %v1781_v24, %v1358_v26 }
0x101f   :  { %v1364_v37 = vmul.f32 %v1362_v36, %v1330_v8 }
0x1021   :  { %v1369_v38 = vmul.f32 %v1716_v28, %v1364_v37 }
0x1023   :  { %v1374_v39 = vadd.f32 %v1717_v30, %v1369_v38 }
0x1025   :  { %1376 = vst.msk [vmem:[#allocation2 + $0x8] sm:$0xff] %vm189_vm6, %v1374_v39 }
0x102c   :  { %v1377_v40 = vld [vmem:[#allocation2] ss:$8 sm:$0x3] }
0x102d   :  { %v1382_v41 = vpack.c.bf16 %v1377_v40, %v1377_v40 }
0x102f   :  { %1652 = vmatmul.msk.bf16.vlgmr.msrb.gmra.mxu0 %vm189_vm6, %v1382_v41 }
0x10ac   :  { %v1411_v42 = vpop.f32.mrf.mxu0 }
0x10ad   :  { %v1412_v47 = vadd.f32 %v1718_v46, %v1411_v42 }
0x10af   :  { %1782 = vtanh.f32 %v1412_v47 }
0x10b4   :  { %v1413_v48 = vpop.f32.mrf.mxu0 }
0x10b5   :  { %v1783_v49 = vpop.eup %1782 }
0x10b6   :  { %v1420_v50 = vpack.c.bf16 %v1783_v49, %v1783_v49 }
0x10b8   :  { %1661 = vmatmul.msk.bf16.vlgmr.msrb.gmra.mxu2 %vm189_vm6, %v1420_v50 }
0x113b   :  { %v1449_v52 = vpop.f32.mrf.mxu2 }
0x113c   :  { %v1450_v53 = vadd.f32 %v1719_v51, %v1449_v52 }
0x113e   :  { %v1455_v54 = vsel %vm1453_vm12, %v1450_v53, -inf  ;;  %1454 = vst.msk [vmem:[%s2354_s24] sm:$0x3] %vm1453_vm12, %v1450_v53  ;;  %s1487_s24 = sshll.u32 %s1822_s23, 4  ;;  %s1488_s24 = int_to_ptr.vmem [resolvable:$true] %s1487_s24 }
0x113f   :  { %1456 = vmax.xlane.f32.xlu1 %v1455_v54 }
0x1143   :  { %v1451_v1 = vpop.f32.mrf.mxu2 }
0x11b2   :  { %v1457_v55 = vpop.xlane.xlu1 %1456 }
0x11b3   :  { %v1458_v56 = vsub.f32 %v1450_v53, %v1457_v55 }
0x11b5   :  { %v1459_v57 = vmul.f32 1.442695, %v1458_v56 }
0x11b7   :  { %1784 = vpow2.f32 %v1459_v57 }
0x11bd   :  { %v1785_v58 = vpop.eup %1784 }
0x11be   :  { %v1461_v2 = vsel %vm1453_vm12, %v1785_v58, 0.0 }
0x11bf   :  { %1462 = vadd.xlane.f32.xlu0 %v1461_v2 }
0x1232   :  { %v1463_v59 = vpop.xlane.xlu0 %1462 }
0x1233   :  { %1786 = vrcp.f32 %v1463_v59  ;;  %v1475_v63 = vand.u32 2147483648, %v1463_v59  ;;  %v1473_v3 = vand.u32 2147483647, %v1463_v59  ;;  %vm1469_vm13 = vweird.f32 %v1463_v59 }
0x1235   :  { %v1476_v5 = vor.u32 1.1754944e-38, %v1475_v63  ;;  %vm1474_vm3 = vcmp.eq.f32.partialorder %v1473_v3, 8.507059e+37 }
0x1239   :  { %v1787_v60 = vpop.eup %1786 }
0x123a   :  { %v1465_v61 = vmul.f32 %v1787_v60, %v1463_v59  ;;  %vm1470_vm6 = vweird.f32 %v1787_v60 }
0x123b   :  { %vm1471_vm1 = vmor %vm1469_vm13, %vm1470_vm6 }
0x123c   :  { %v1466_v62 = vsub.f32 1.0, %v1465_v61 }
0x123e   :  { %v1467_v0 = vmul.f32 %v1787_v60, %v1466_v62 }
0x1240   :  { %v1468_v4 = vadd.f32 %v1787_v60, %v1467_v0 }
0x1242   :  { %v1472_v6 = vsel %vm1471_vm1, %v1787_v60, %v1468_v4 }
0x1243   :  { %v1477_v7 = vsel %vm1474_vm3, %v1476_v5, %v1472_v6 }
0x1244   :  { %v1478_v8 = vmul.f32 %v1785_v58, %v1477_v7 }
0x1246   :  { %1479 = vst.msk [vmem:[#allocation3] sm:$0x3] %vm1453_vm12, %v1478_v8 }
0x1247   :  { %1492 = dma.vmem_to_hbm [thread:$0]  %s1488_s24, 32, %s1490_s7, [#allocation4]  }
0x1248   :  { %1812 = dma.done.wait [#allocation4], 32  }
0x1249   :  { %1813 = vsyncadd [#allocation4], 4294967264 }
0x124a   :  { %1499 = vsyncpa [#allocation4], 1 }

</bundles_post_ra>
